<compile_context>
chip_gen: v5e
topology: v5e:2x2
jax: 0.10.0
libtpu: 0.0.40
codegen_flags: <defaults>
</compile_context>

<pallas_src>
import jax
import jax.numpy as jnp
from jax import lax
from jax.experimental import pallas as pl
from jax.experimental.pallas import tpu as pltpu


def literal_listener_kernel(embeds_ref, mask_ref, w_ih_ref, w_hh_ref, b_ref,
                            w_head_ref, b_head_ref, cvec_ref, out_ref, xg_ref):
    T, B, E = embeds_ref.shape
    H = w_hh_ref.shape[0]
    H4 = w_hh_ref.shape[1]                 # 4*H, gate order i, f, g, o (PyTorch LSTM order)
    C = cvec_ref.shape[2]

    # ---- Phase 1: one MXU pass for every timestep's input->gate projection (+ fused bias).
    # (T,B,E) -> (T*B,E) keeps the lane dim, so the reshape is a free layout view.
    x_all = embeds_ref[...].reshape(T * B, E)
    xg = (jnp.dot(x_all, w_ih_ref[...], preferred_element_type=jnp.float32)
          + b_ref[...])                    # (T*B, 4H) lane-dense, bias folded in once
    xg_ref[...] = xg.reshape(T, B, H4)     # parked in VMEM scratch; 1 vreg per step

    w_hh = w_hh_ref[...]                   # (H, 4H) fused hidden->gates weight

    # ---- Phase 2: serial recurrence (latency-bound): one MXU dot + VPU/EUP per step.
    def step(t, carry):
        h, c = carry
        gates = xg_ref[t] + jnp.dot(h, w_hh, preferred_element_type=jnp.float32)  # (B, 4H)
        i_g = jax.nn.sigmoid(gates[:, 0 * H:1 * H])
        f_g = jax.nn.sigmoid(gates[:, 1 * H:2 * H])
        g_g = jnp.tanh(gates[:, 2 * H:3 * H])
        o_g = jax.nn.sigmoid(gates[:, 3 * H:4 * H])
        c_new = f_g * c + i_g * g_g
        h_new = o_g * jnp.tanh(c_new)
        # emulate pack_padded_sequence: freeze (h, c) once past each sequence's length
        valid = mask_ref[t]                # (B, H) precomputed 0/1 f32, no per-step broadcast
        h = h + valid * (h_new - h)
        c = c + valid * (c_new - c)
        return (h, c)

    h0 = jnp.zeros((B, H), jnp.float32)
    c0 = jnp.zeros((B, H), jnp.float32)
    h_final, _ = lax.fori_loop(0, T, step, (h0, c0), unroll=True)

    # ---- Phase 3: fused description_representation / covariance head (one matmul) + scores.
    head = (jnp.dot(h_final, w_head_ref[...], preferred_element_type=jnp.float32)
            + b_head_ref[...])             # (B, 128) = [rep | cov | zero pad]
    rep = head[:, :C]                      # (B, C)
    cov = head[:, C:C + C * C].reshape(B, C, C)        # (B, C, C) row-major (== torch.reshape)

    # score_i = -(cv_i - rep)^T @ cov @ (cv_i - rep) for the 3 colour candidates.
    delta = cvec_ref[...] - rep[:, None, :]            # (B, 3, C)
    md = lax.dot_general(delta, cov,
                         dimension_numbers=(((2,), (1,)), ((0,), (0,))),
                         preferred_element_type=jnp.float32)   # (B, 3, C) batched matmul
    scores = -jnp.sum(md * delta, axis=-1)             # (B, 3)

    # Lane-dense writeback: scores live in lanes 0..2, zeros elsewhere (sliced in the wrapper).
    out_lanes = out_ref.shape[1]
    out_ref[...] = jnp.concatenate(
        [scores, jnp.zeros((B, out_lanes - 3), jnp.float32)], axis=-1)


def pack_params(raw):
    """Fuse the per-gate LSTM weights and the two head Linears into lane-dense matrices."""
    w_ih, w_hh = raw["w_ih"], raw["w_hh"]                 # (4, E, H), (4, H, H)
    H = w_ih.shape[2]
    C = raw["w_rep"].shape[1]
    w_ih_f = jnp.concatenate([w_ih[k] for k in range(4)], axis=1)   # (E, 4H)
    w_hh_f = jnp.concatenate([w_hh[k] for k in range(4)], axis=1)   # (H, 4H)
    b_f = raw["b"].reshape(1, 4 * H)                                # (1, 4H), b_ih + b_hh

    head_w = jnp.concatenate([raw["w_rep"], raw["w_cov"]], axis=1)  # (H, C + C*C)
    head_b = jnp.concatenate([raw["b_rep"], raw["b_cov"]], axis=1)  # (1, C + C*C)
    head_lanes = max(128, ((C + C * C + 127) // 128) * 128)         # pad to lane-dense width
    pad = head_lanes - head_w.shape[1]
    head_w = jnp.pad(head_w, ((0, 0), (0, pad)))
    head_b = jnp.pad(head_b, ((0, 0), (0, pad)))
    return {"emb": raw["emb"], "w_ih_f": w_ih_f, "w_hh_f": w_hh_f, "b_f": b_f,
            "w_head": head_w, "b_head": head_b}


def literal_listener_forward(x, c_vec, packed):
    """x: (B, T) int32 token ids; c_vec: (B, 3, C) f32. Returns scores (B, 3) f32."""
    B, T = x.shape
    H = packed["w_hh_f"].shape[0]
    H4 = packed["w_hh_f"].shape[1]

    # Pad batch to a multiple of 8 sublanes. Padded rows have length 0 -> state stays 0,
    # their (garbage but finite) scores are sliced off below.
    B_pad = ((B + 7) // 8) * 8
    pad_b = B_pad - B
    x_p = jnp.pad(x, ((0, pad_b), (0, 0)))
    c_vec_p = jnp.pad(c_vec, ((0, pad_b), (0, 0), (0, 0)))

    embeds = jnp.take(packed["emb"], x_p, axis=0)          # (B_pad, T, E)   glue: gather
    embeds_tm = jnp.transpose(embeds, (1, 0, 2))           # (T, B_pad, E)   time-major
    lengths = jnp.count_nonzero(x_p, axis=1).astype(jnp.int32)            # (B_pad,)
    tpos = jnp.arange(T, dtype=jnp.int32)
    mask = (lengths[None, :] > tpos[:, None]).astype(jnp.float32)         # (T, B_pad)
    mask = jnp.broadcast_to(mask[:, :, None], (T, B_pad, H))              # (T, B_pad, H)

    OUT_LANES = 128
    vmem = lambda: pl.BlockSpec(memory_space=pltpu.MemorySpace.VMEM)
    out = pl.pallas_call(
        literal_listener_kernel,
        out_shape=jax.ShapeDtypeStruct((B_pad, OUT_LANES), jnp.float32),
        in_specs=[vmem() for _ in range(8)],
        out_specs=vmem(),
        scratch_shapes=[pltpu.VMEM((T, B_pad, H4), jnp.float32)],   # precomputed gate slabs
    )(embeds_tm, mask,
      packed["w_ih_f"], packed["w_hh_f"], packed["b_f"],
      packed["w_head"], packed["b_head"],
      c_vec_p)
    return out[:B, :3]


def reference_forward(x, c_vec, raw):
    """Pure-JAX reference of the same forward pass (unfused params), for validation."""
    embeds = jnp.take(raw["emb"], x, axis=0)
    lengths = jnp.count_nonzero(x, axis=1).astype(jnp.int32)[:, None]
    B, T, E = embeds.shape
    H = raw["w_hh"].shape[1]
    C = raw["w_rep"].shape[1]
    h = jnp.zeros((B, H), jnp.float32)
    c = jnp.zeros((B, H), jnp.float32)
    for t in range(T):
        x_t = embeds[:, t, :]
        gates = [x_t @ raw["w_ih"][k] + h @ raw["w_hh"][k] + raw["b"][k] for k in range(4)]
        i_g = jax.nn.sigmoid(gates[0]); f_g = jax.nn.sigmoid(gates[1])
        g_g = jnp.tanh(gates[2]);       o_g = jax.nn.sigmoid(gates[3])
        c_new = f_g * c + i_g * g_g
        h_new = o_g * jnp.tanh(c_new)
        valid = (lengths > t).astype(jnp.float32)
        h = valid * h_new + (1.0 - valid) * h
        c = valid * c_new + (1.0 - valid) * c
    rep = h @ raw["w_rep"] + raw["b_rep"]
    cov = (h @ raw["w_cov"] + raw["b_cov"]).reshape(B, C, C)
    outs = []
    for i in range(3):
        delta = c_vec[:, i, :] - rep
        outs.append(-jnp.einsum("bj,bjk,bk->b", delta, cov, delta)[:, None])
    return jnp.concatenate(outs, axis=-1)


if __name__ == "__main__":
    # small, module-consistent shapes
    B, T = 4, 8                 # batch, sequence length
    V, E, H, C = 50, 32, 32, 8  # vocab_size, embedding_dim, hidden_dim, colour_vector_dim

    key = jax.random.PRNGKey(0)
    keys = jax.random.split(key, 12)
    s = 0.1

    emb = s * jax.random.normal(keys[0], (V, E), jnp.float32)
    emb = emb.at[0].set(0.0)                                   # padding_idx=0
    raw = {
        "emb":   emb,
        "w_ih":  s * jax.random.normal(keys[1], (4, E, H), jnp.float32),
        "w_hh":  s * jax.random.normal(keys[2], (4, H, H), jnp.float32),
        "b":     (s * jax.random.normal(keys[3], (4, 1, H), jnp.float32)
                  + s * jax.random.normal(keys[4], (4, 1, H), jnp.float32)),  # b_ih + b_hh
        "w_rep": s * jax.random.normal(keys[5], (H, C), jnp.float32),
        "b_rep": s * jax.random.normal(keys[6], (1, C), jnp.float32),
        "w_cov": s * jax.random.normal(keys[7], (H, C * C), jnp.float32),
        "b_cov": s * jax.random.normal(keys[8], (1, C * C), jnp.float32),
    }
    packed = pack_params(raw)

    # token ids: nonzero prefix of random length per row, zero padding after
    lens = 1 + jax.random.randint(keys[9], (B,), 0, T)                 # in [1, T]
    toks = jax.random.randint(keys[10], (B, T), 1, V)                  # nonzero ids
    pos = jnp.arange(T)[None, :]
    x = jnp.where(pos < lens[:, None], toks, 0).astype(jnp.int32)      # (B, T)

    c_vec = jax.random.normal(keys[11], (B, 3, C), jnp.float32)        # 3 colour candidates

    scores = literal_listener_forward(x, c_vec, packed)
    scores = jax.block_until_ready(scores)

    ref = reference_forward(x, c_vec, raw)
    assert scores.shape == (B, 3)
    assert jnp.allclose(scores, ref, rtol=5e-2, atol=5e-3), (scores, ref)

    print("KERNEL_OK")
</pallas_src>

<mosaic_0001>
module attributes {stable_mosaic.version = 11 : i64} {
  func.func @literal_listener_kernel(%arg0: memref<8x8x32xf32, #tpu.memory_space<vmem>>, %arg1: memref<8x8x32xf32, #tpu.memory_space<vmem>>, %arg2: memref<32x128xf32, #tpu.memory_space<vmem>>, %arg3: memref<32x128xf32, #tpu.memory_space<vmem>>, %arg4: memref<1x128xf32, #tpu.memory_space<vmem>>, %arg5: memref<32x128xf32, #tpu.memory_space<vmem>>, %arg6: memref<1x128xf32, #tpu.memory_space<vmem>>, %arg7: memref<8x3x8xf32, #tpu.memory_space<vmem>>, %arg8: memref<8x128xf32, #tpu.memory_space<vmem>>, %arg9: memref<8x8x128xf32, #tpu.memory_space<vmem>>) attributes {dimension_semantics = [], scalar_prefetch = 0 : i64, scratch_operands = 1 : i64, tpu.core_type = #tpu.core_type<tc>} {
    %c0 = arith.constant 0 : index
    %c0_0 = arith.constant 0 : index
    %c0_1 = arith.constant 0 : index
    %0 = vector.load %arg0[%c0, %c0_0, %c0_1] : memref<8x8x32xf32, #tpu.memory_space<vmem>>, vector<8x8x32xf32>
    %1 = vector.shape_cast %0 : vector<8x8x32xf32> to vector<64x32xf32>
    %c0_2 = arith.constant 0 : index
    %c0_3 = arith.constant 0 : index
    %2 = vector.load %arg2[%c0_2, %c0_3] : memref<32x128xf32, #tpu.memory_space<vmem>>, vector<32x128xf32>
    %cst = arith.constant dense<0.000000e+00> : vector<64x128xf32>
    %3 = tpu.matmul %1, %2, %cst {dimension_numbers = #tpu.dot_dimension_numbers<[1], [0], [0], [1], [0, 0, 1, 1], [], []>} : vector<64x32xf32>, vector<32x128xf32>, vector<64x128xf32> -> vector<64x128xf32>
    %c0_4 = arith.constant 0 : index
    %c0_5 = arith.constant 0 : index
    %4 = vector.load %arg4[%c0_4, %c0_5] : memref<1x128xf32, #tpu.memory_space<vmem>>, vector<1x128xf32>
    %5 = vector.broadcast %4 : vector<1x128xf32> to vector<64x128xf32>
    %6 = arith.addf %3, %5 : vector<64x128xf32>
    %7 = vector.shape_cast %6 : vector<64x128xf32> to vector<8x8x128xf32>
    %c0_6 = arith.constant 0 : index
    %c0_7 = arith.constant 0 : index
    %c0_8 = arith.constant 0 : index
    %8 = vector.load %arg9[%c0_6, %c0_7, %c0_8] : memref<8x8x128xf32, #tpu.memory_space<vmem>>, vector<8x8x128xf32>
    tpu.vector_store %arg9[%c0_6, %c0_7, %c0_8], %7 {strides = array<i32>} : memref<8x8x128xf32, #tpu.memory_space<vmem>>, vector<8x8x128xf32>,
    %c0_9 = arith.constant 0 : index
    %c0_10 = arith.constant 0 : index
    %9 = vector.load %arg3[%c0_9, %c0_10] : memref<32x128xf32, #tpu.memory_space<vmem>>, vector<32x128xf32>
    %cst_11 = arith.constant 0.000000e+00 : f32
    %10 = vector.broadcast %cst_11 : f32 to vector<8x32xf32>
    %cst_12 = arith.constant 0.000000e+00 : f32
    %11 = vector.broadcast %cst_12 : f32 to vector<8x32xf32>
    %c0_i32 = arith.constant 0 : i32
    %12 = arith.index_cast %c0_i32 : i32 to index
    %c0_13 = arith.constant 0 : index
    %c0_14 = arith.constant 0 : index
    %13 = vector.load %arg9[%12, %c0_13, %c0_14] : memref<8x8x128xf32, #tpu.memory_space<vmem>>, vector<1x8x128xf32>
    %14 = vector.shape_cast %13 : vector<1x8x128xf32> to vector<8x128xf32>
    %cst_15 = arith.constant dense<0.000000e+00> : vector<8x128xf32>
    %15 = tpu.matmul %10, %9, %cst_15 {dimension_numbers = #tpu.dot_dimension_numbers<[1], [0], [0], [1], [0, 0, 1, 1], [], []>} : vector<8x32xf32>, vector<32x128xf32>, vector<8x128xf32> -> vector<8x128xf32>
    %16 = arith.addf %14, %15 : vector<8x128xf32>
    %17 = vector.extract_strided_slice %16 {offsets = [0, 0], sizes = [8, 32], strides = [1, 1]} : vector<8x128xf32> to vector<8x32xf32>
    %18 = arith.negf %17 : vector<8x32xf32>
    %19 = math.exp %18 : vector<8x32xf32>
    %cst_16 = arith.constant 1.000000e+00 : f32
    %20 = vector.broadcast %cst_16 : f32 to vector<8x32xf32>
    %21 = arith.addf %20, %19 : vector<8x32xf32>
    %22 = arith.divf %20, %21 : vector<8x32xf32>
    %23 = vector.extract_strided_slice %16 {offsets = [0, 32], sizes = [8, 32], strides = [1, 1]} : vector<8x128xf32> to vector<8x32xf32>
    %24 = arith.negf %23 : vector<8x32xf32>
    %25 = math.exp %24 : vector<8x32xf32>
    %cst_17 = arith.constant 1.000000e+00 : f32
    %26 = vector.broadcast %cst_17 : f32 to vector<8x32xf32>
    %27 = arith.addf %26, %25 : vector<8x32xf32>
    %28 = arith.divf %26, %27 : vector<8x32xf32>
    %29 = vector.extract_strided_slice %16 {offsets = [0, 64], sizes = [8, 32], strides = [1, 1]} : vector<8x128xf32> to vector<8x32xf32>
    %30 = math.tanh %29 : vector<8x32xf32>
    %31 = vector.extract_strided_slice %16 {offsets = [0, 96], sizes = [8, 32], strides = [1, 1]} : vector<8x128xf32> to vector<8x32xf32>
    %32 = arith.negf %31 : vector<8x32xf32>
    %33 = math.exp %32 : vector<8x32xf32>
    %cst_18 = arith.constant 1.000000e+00 : f32
    %34 = vector.broadcast %cst_18 : f32 to vector<8x32xf32>
    %35 = arith.addf %34, %33 : vector<8x32xf32>
    %36 = arith.divf %34, %35 : vector<8x32xf32>
    %37 = arith.mulf %28, %11 : vector<8x32xf32>
    %38 = arith.mulf %22, %30 : vector<8x32xf32>
    %39 = arith.addf %37, %38 : vector<8x32xf32>
    %40 = math.tanh %39 : vector<8x32xf32>
    %41 = arith.mulf %36, %40 : vector<8x32xf32>
    %42 = arith.index_cast %c0_i32 : i32 to index
    %c0_19 = arith.constant 0 : index
    %c0_20 = arith.constant 0 : index
    %43 = vector.load %arg1[%42, %c0_19, %c0_20] : memref<8x8x32xf32, #tpu.memory_space<vmem>>, vector<1x8x32xf32>
    %44 = vector.shape_cast %43 : vector<1x8x32xf32> to vector<8x32xf32>
    %45 = arith.subf %41, %10 : vector<8x32xf32>
    %46 = arith.mulf %44, %45 : vector<8x32xf32>
    %47 = arith.addf %10, %46 : vector<8x32xf32>
    %48 = arith.subf %39, %11 : vector<8x32xf32>
    %49 = arith.mulf %44, %48 : vector<8x32xf32>
    %50 = arith.addf %11, %49 : vector<8x32xf32>
    %c1_i32 = arith.constant 1 : i32
    %51 = arith.index_cast %c1_i32 : i32 to index
    %c0_21 = arith.constant 0 : index
    %c0_22 = arith.constant 0 : index
    %52 = vector.load %arg9[%51, %c0_21, %c0_22] : memref<8x8x128xf32, #tpu.memory_space<vmem>>, vector<1x8x128xf32>
    %53 = vector.shape_cast %52 : vector<1x8x128xf32> to vector<8x128xf32>
    %cst_23 = arith.constant dense<0.000000e+00> : vector<8x128xf32>
    %54 = tpu.matmul %47, %9, %cst_23 {dimension_numbers = #tpu.dot_dimension_numbers<[1], [0], [0], [1], [0, 0, 1, 1], [], []>} : vector<8x32xf32>, vector<32x128xf32>, vector<8x128xf32> -> vector<8x128xf32>
    %55 = arith.addf %53, %54 : vector<8x128xf32>
    %56 = vector.extract_strided_slice %55 {offsets = [0, 0], sizes = [8, 32], strides = [1, 1]} : vector<8x128xf32> to vector<8x32xf32>
    %57 = arith.negf %56 : vector<8x32xf32>
    %58 = math.exp %57 : vector<8x32xf32>
    %cst_24 = arith.constant 1.000000e+00 : f32
    %59 = vector.broadcast %cst_24 : f32 to vector<8x32xf32>
    %60 = arith.addf %59, %58 : vector<8x32xf32>
    %61 = arith.divf %59, %60 : vector<8x32xf32>
    %62 = vector.extract_strided_slice %55 {offsets = [0, 32], sizes = [8, 32], strides = [1, 1]} : vector<8x128xf32> to vector<8x32xf32>
    %63 = arith.negf %62 : vector<8x32xf32>
    %64 = math.exp %63 : vector<8x32xf32>
    %cst_25 = arith.constant 1.000000e+00 : f32
    %65 = vector.broadcast %cst_25 : f32 to vector<8x32xf32>
    %66 = arith.addf %65, %64 : vector<8x32xf32>
    %67 = arith.divf %65, %66 : vector<8x32xf32>
    %68 = vector.extract_strided_slice %55 {offsets = [0, 64], sizes = [8, 32], strides = [1, 1]} : vector<8x128xf32> to vector<8x32xf32>
    %69 = math.tanh %68 : vector<8x32xf32>
    %70 = vector.extract_strided_slice %55 {offsets = [0, 96], sizes = [8, 32], strides = [1, 1]} : vector<8x128xf32> to vector<8x32xf32>
    %71 = arith.negf %70 : vector<8x32xf32>
    %72 = math.exp %71 : vector<8x32xf32>
    %cst_26 = arith.constant 1.000000e+00 : f32
    %73 = vector.broadcast %cst_26 : f32 to vector<8x32xf32>
    %74 = arith.addf %73, %72 : vector<8x32xf32>
    %75 = arith.divf %73, %74 : vector<8x32xf32>
    %76 = arith.mulf %67, %50 : vector<8x32xf32>
    %77 = arith.mulf %61, %69 : vector<8x32xf32>
    %78 = arith.addf %76, %77 : vector<8x32xf32>
    %79 = math.tanh %78 : vector<8x32xf32>
    %80 = arith.mulf %75, %79 : vector<8x32xf32>
    %81 = arith.index_cast %c1_i32 : i32 to index
    %c0_27 = arith.constant 0 : index
    %c0_28 = arith.constant 0 : index
    %82 = vector.load %arg1[%81, %c0_27, %c0_28] : memref<8x8x32xf32, #tpu.memory_space<vmem>>, vector<1x8x32xf32>
    %83 = vector.shape_cast %82 : vector<1x8x32xf32> to vector<8x32xf32>
    %84 = arith.subf %80, %47 : vector<8x32xf32>
    %85 = arith.mulf %83, %84 : vector<8x32xf32>
    %86 = arith.addf %47, %85 : vector<8x32xf32>
    %87 = arith.subf %78, %50 : vector<8x32xf32>
    %88 = arith.mulf %83, %87 : vector<8x32xf32>
    %89 = arith.addf %50, %88 : vector<8x32xf32>
    %c2_i32 = arith.constant 2 : i32
    %90 = arith.index_cast %c2_i32 : i32 to index
    %c0_29 = arith.constant 0 : index
    %c0_30 = arith.constant 0 : index
    %91 = vector.load %arg9[%90, %c0_29, %c0_30] : memref<8x8x128xf32, #tpu.memory_space<vmem>>, vector<1x8x128xf32>
    %92 = vector.shape_cast %91 : vector<1x8x128xf32> to vector<8x128xf32>
    %cst_31 = arith.constant dense<0.000000e+00> : vector<8x128xf32>
    %93 = tpu.matmul %86, %9, %cst_31 {dimension_numbers = #tpu.dot_dimension_numbers<[1], [0], [0], [1], [0, 0, 1, 1], [], []>} : vector<8x32xf32>, vector<32x128xf32>, vector<8x128xf32> -> vector<8x128xf32>
    %94 = arith.addf %92, %93 : vector<8x128xf32>
    %95 = vector.extract_strided_slice %94 {offsets = [0, 0], sizes = [8, 32], strides = [1, 1]} : vector<8x128xf32> to vector<8x32xf32>
    %96 = arith.negf %95 : vector<8x32xf32>
    %97 = math.exp %96 : vector<8x32xf32>
    %cst_32 = arith.constant 1.000000e+00 : f32
    %98 = vector.broadcast %cst_32 : f32 to vector<8x32xf32>
    %99 = arith.addf %98, %97 : vector<8x32xf32>
    %100 = arith.divf %98, %99 : vector<8x32xf32>
    %101 = vector.extract_strided_slice %94 {offsets = [0, 32], sizes = [8, 32], strides = [1, 1]} : vector<8x128xf32> to vector<8x32xf32>
    %102 = arith.negf %101 : vector<8x32xf32>
    %103 = math.exp %102 : vector<8x32xf32>
    %cst_33 = arith.constant 1.000000e+00 : f32
    %104 = vector.broadcast %cst_33 : f32 to vector<8x32xf32>
    %105 = arith.addf %104, %103 : vector<8x32xf32>
    %106 = arith.divf %104, %105 : vector<8x32xf32>
    %107 = vector.extract_strided_slice %94 {offsets = [0, 64], sizes = [8, 32], strides = [1, 1]} : vector<8x128xf32> to vector<8x32xf32>
    %108 = math.tanh %107 : vector<8x32xf32>
    %109 = vector.extract_strided_slice %94 {offsets = [0, 96], sizes = [8, 32], strides = [1, 1]} : vector<8x128xf32> to vector<8x32xf32>
    %110 = arith.negf %109 : vector<8x32xf32>
    %111 = math.exp %110 : vector<8x32xf32>
    %cst_34 = arith.constant 1.000000e+00 : f32
    %112 = vector.broadcast %cst_34 : f32 to vector<8x32xf32>
    %113 = arith.addf %112, %111 : vector<8x32xf32>
    %114 = arith.divf %112, %113 : vector<8x32xf32>
    %115 = arith.mulf %106, %89 : vector<8x32xf32>
    %116 = arith.mulf %100, %108 : vector<8x32xf32>
    %117 = arith.addf %115, %116 : vector<8x32xf32>
    %118 = math.tanh %117 : vector<8x32xf32>
    %119 = arith.mulf %114, %118 : vector<8x32xf32>
    %120 = arith.index_cast %c2_i32 : i32 to index
    %c0_35 = arith.constant 0 : index
    %c0_36 = arith.constant 0 : index
    %121 = vector.load %arg1[%120, %c0_35, %c0_36] : memref<8x8x32xf32, #tpu.memory_space<vmem>>, vector<1x8x32xf32>
    %122 = vector.shape_cast %121 : vector<1x8x32xf32> to vector<8x32xf32>
    %123 = arith.subf %119, %86 : vector<8x32xf32>
    %124 = arith.mulf %122, %123 : vector<8x32xf32>
    %125 = arith.addf %86, %124 : vector<8x32xf32>
    %126 = arith.subf %117, %89 : vector<8x32xf32>
    %127 = arith.mulf %122, %126 : vector<8x32xf32>
    %128 = arith.addf %89, %127 : vector<8x32xf32>
    %c3_i32 = arith.constant 3 : i32
    %129 = arith.index_cast %c3_i32 : i32 to index
    %c0_37 = arith.constant 0 : index
    %c0_38 = arith.constant 0 : index
    %130 = vector.load %arg9[%129, %c0_37, %c0_38] : memref<8x8x128xf32, #tpu.memory_space<vmem>>, vector<1x8x128xf32>
    %131 = vector.shape_cast %130 : vector<1x8x128xf32> to vector<8x128xf32>
    %cst_39 = arith.constant dense<0.000000e+00> : vector<8x128xf32>
    %132 = tpu.matmul %125, %9, %cst_39 {dimension_numbers = #tpu.dot_dimension_numbers<[1], [0], [0], [1], [0, 0, 1, 1], [], []>} : vector<8x32xf32>, vector<32x128xf32>, vector<8x128xf32> -> vector<8x128xf32>
    %133 = arith.addf %131, %132 : vector<8x128xf32>
    %134 = vector.extract_strided_slice %133 {offsets = [0, 0], sizes = [8, 32], strides = [1, 1]} : vector<8x128xf32> to vector<8x32xf32>
    %135 = arith.negf %134 : vector<8x32xf32>
    %136 = math.exp %135 : vector<8x32xf32>
    %cst_40 = arith.constant 1.000000e+00 : f32
    %137 = vector.broadcast %cst_40 : f32 to vector<8x32xf32>
    %138 = arith.addf %137, %136 : vector<8x32xf32>
    %139 = arith.divf %137, %138 : vector<8x32xf32>
    %140 = vector.extract_strided_slice %133 {offsets = [0, 32], sizes = [8, 32], strides = [1, 1]} : vector<8x128xf32> to vector<8x32xf32>
    %141 = arith.negf %140 : vector<8x32xf32>
    %142 = math.exp %141 : vector<8x32xf32>
    %cst_41 = arith.constant 1.000000e+00 : f32
    %143 = vector.broadcast %cst_41 : f32 to vector<8x32xf32>
    %144 = arith.addf %143, %142 : vector<8x32xf32>
    %145 = arith.divf %143, %144 : vector<8x32xf32>
    %146 = vector.extract_strided_slice %133 {offsets = [0, 64], sizes = [8, 32], strides = [1, 1]} : vector<8x128xf32> to vector<8x32xf32>
    %147 = math.tanh %146 : vector<8x32xf32>
    %148 = vector.extract_strided_slice %133 {offsets = [0, 96], sizes = [8, 32], strides = [1, 1]} : vector<8x128xf32> to vector<8x32xf32>
    %149 = arith.negf %148 : vector<8x32xf32>
    %150 = math.exp %149 : vector<8x32xf32>
    %cst_42 = arith.constant 1.000000e+00 : f32
    %151 = vector.broadcast %cst_42 : f32 to vector<8x32xf32>
    %152 = arith.addf %151, %150 : vector<8x32xf32>
    %153 = arith.divf %151, %152 : vector<8x32xf32>
    %154 = arith.mulf %145, %128 : vector<8x32xf32>
    %155 = arith.mulf %139, %147 : vector<8x32xf32>
    %156 = arith.addf %154, %155 : vector<8x32xf32>
    %157 = math.tanh %156 : vector<8x32xf32>
    %158 = arith.mulf %153, %157 : vector<8x32xf32>
    %159 = arith.index_cast %c3_i32 : i32 to index
    %c0_43 = arith.constant 0 : index
    %c0_44 = arith.constant 0 : index
    %160 = vector.load %arg1[%159, %c0_43, %c0_44] : memref<8x8x32xf32, #tpu.memory_space<vmem>>, vector<1x8x32xf32>
    %161 = vector.shape_cast %160 : vector<1x8x32xf32> to vector<8x32xf32>
    %162 = arith.subf %158, %125 : vector<8x32xf32>
    %163 = arith.mulf %161, %162 : vector<8x32xf32>
    %164 = arith.addf %125, %163 : vector<8x32xf32>
    %165 = arith.subf %156, %128 : vector<8x32xf32>
    %166 = arith.mulf %161, %165 : vector<8x32xf32>
    %167 = arith.addf %128, %166 : vector<8x32xf32>
    %c4_i32 = arith.constant 4 : i32
    %168 = arith.index_cast %c4_i32 : i32 to index
    %c0_45 = arith.constant 0 : index
    %c0_46 = arith.constant 0 : index
    %169 = vector.load %arg9[%168, %c0_45, %c0_46] : memref<8x8x128xf32, #tpu.memory_space<vmem>>, vector<1x8x128xf32>
    %170 = vector.shape_cast %169 : vector<1x8x128xf32> to vector<8x128xf32>
    %cst_47 = arith.constant dense<0.000000e+00> : vector<8x128xf32>
    %171 = tpu.matmul %164, %9, %cst_47 {dimension_numbers = #tpu.dot_dimension_numbers<[1], [0], [0], [1], [0, 0, 1, 1], [], []>} : vector<8x32xf32>, vector<32x128xf32>, vector<8x128xf32> -> vector<8x128xf32>
    %172 = arith.addf %170, %171 : vector<8x128xf32>
    %173 = vector.extract_strided_slice %172 {offsets = [0, 0], sizes = [8, 32], strides = [1, 1]} : vector<8x128xf32> to vector<8x32xf32>
    %174 = arith.negf %173 : vector<8x32xf32>
    %175 = math.exp %174 : vector<8x32xf32>
    %cst_48 = arith.constant 1.000000e+00 : f32
    %176 = vector.broadcast %cst_48 : f32 to vector<8x32xf32>
    %177 = arith.addf %176, %175 : vector<8x32xf32>
    %178 = arith.divf %176, %177 : vector<8x32xf32>
    %179 = vector.extract_strided_slice %172 {offsets = [0, 32], sizes = [8, 32], strides = [1, 1]} : vector<8x128xf32> to vector<8x32xf32>
    %180 = arith.negf %179 : vector<8x32xf32>
    %181 = math.exp %180 : vector<8x32xf32>
    %cst_49 = arith.constant 1.000000e+00 : f32
    %182 = vector.broadcast %cst_49 : f32 to vector<8x32xf32>
    %183 = arith.addf %182, %181 : vector<8x32xf32>
    %184 = arith.divf %182, %183 : vector<8x32xf32>
    %185 = vector.extract_strided_slice %172 {offsets = [0, 64], sizes = [8, 32], strides = [1, 1]} : vector<8x128xf32> to vector<8x32xf32>
    %186 = math.tanh %185 : vector<8x32xf32>
    %187 = vector.extract_strided_slice %172 {offsets = [0, 96], sizes = [8, 32], strides = [1, 1]} : vector<8x128xf32> to vector<8x32xf32>
    %188 = arith.negf %187 : vector<8x32xf32>
    %189 = math.exp %188 : vector<8x32xf32>
    %cst_50 = arith.constant 1.000000e+00 : f32
    %190 = vector.broadcast %cst_50 : f32 to vector<8x32xf32>
    %191 = arith.addf %190, %189 : vector<8x32xf32>
    %192 = arith.divf %190, %191 : vector<8x32xf32>
    %193 = arith.mulf %184, %167 : vector<8x32xf32>
    %194 = arith.mulf %178, %186 : vector<8x32xf32>
    %195 = arith.addf %193, %194 : vector<8x32xf32>
    %196 = math.tanh %195 : vector<8x32xf32>
    %197 = arith.mulf %192, %196 : vector<8x32xf32>
    %198 = arith.index_cast %c4_i32 : i32 to index
    %c0_51 = arith.constant 0 : index
    %c0_52 = arith.constant 0 : index
    %199 = vector.load %arg1[%198, %c0_51, %c0_52] : memref<8x8x32xf32, #tpu.memory_space<vmem>>, vector<1x8x32xf32>
    %200 = vector.shape_cast %199 : vector<1x8x32xf32> to vector<8x32xf32>
    %201 = arith.subf %197, %164 : vector<8x32xf32>
    %202 = arith.mulf %200, %201 : vector<8x32xf32>
    %203 = arith.addf %164, %202 : vector<8x32xf32>
    %204 = arith.subf %195, %167 : vector<8x32xf32>
    %205 = arith.mulf %200, %204 : vector<8x32xf32>
    %206 = arith.addf %167, %205 : vector<8x32xf32>
    %c5_i32 = arith.constant 5 : i32
    %207 = arith.index_cast %c5_i32 : i32 to index
    %c0_53 = arith.constant 0 : index
    %c0_54 = arith.constant 0 : index
    %208 = vector.load %arg9[%207, %c0_53, %c0_54] : memref<8x8x128xf32, #tpu.memory_space<vmem>>, vector<1x8x128xf32>
    %209 = vector.shape_cast %208 : vector<1x8x128xf32> to vector<8x128xf32>
    %cst_55 = arith.constant dense<0.000000e+00> : vector<8x128xf32>
    %210 = tpu.matmul %203, %9, %cst_55 {dimension_numbers = #tpu.dot_dimension_numbers<[1], [0], [0], [1], [0, 0, 1, 1], [], []>} : vector<8x32xf32>, vector<32x128xf32>, vector<8x128xf32> -> vector<8x128xf32>
    %211 = arith.addf %209, %210 : vector<8x128xf32>
    %212 = vector.extract_strided_slice %211 {offsets = [0, 0], sizes = [8, 32], strides = [1, 1]} : vector<8x128xf32> to vector<8x32xf32>
    %213 = arith.negf %212 : vector<8x32xf32>
    %214 = math.exp %213 : vector<8x32xf32>
    %cst_56 = arith.constant 1.000000e+00 : f32
    %215 = vector.broadcast %cst_56 : f32 to vector<8x32xf32>
    %216 = arith.addf %215, %214 : vector<8x32xf32>
    %217 = arith.divf %215, %216 : vector<8x32xf32>
    %218 = vector.extract_strided_slice %211 {offsets = [0, 32], sizes = [8, 32], strides = [1, 1]} : vector<8x128xf32> to vector<8x32xf32>
    %219 = arith.negf %218 : vector<8x32xf32>
    %220 = math.exp %219 : vector<8x32xf32>
    %cst_57 = arith.constant 1.000000e+00 : f32
    %221 = vector.broadcast %cst_57 : f32 to vector<8x32xf32>
    %222 = arith.addf %221, %220 : vector<8x32xf32>
    %223 = arith.divf %221, %222 : vector<8x32xf32>
    %224 = vector.extract_strided_slice %211 {offsets = [0, 64], sizes = [8, 32], strides = [1, 1]} : vector<8x128xf32> to vector<8x32xf32>
    %225 = math.tanh %224 : vector<8x32xf32>
    %226 = vector.extract_strided_slice %211 {offsets = [0, 96], sizes = [8, 32], strides = [1, 1]} : vector<8x128xf32> to vector<8x32xf32>
    %227 = arith.negf %226 : vector<8x32xf32>
    %228 = math.exp %227 : vector<8x32xf32>
    %cst_58 = arith.constant 1.000000e+00 : f32
    %229 = vector.broadcast %cst_58 : f32 to vector<8x32xf32>
    %230 = arith.addf %229, %228 : vector<8x32xf32>
    %231 = arith.divf %229, %230 : vector<8x32xf32>
    %232 = arith.mulf %223, %206 : vector<8x32xf32>
    %233 = arith.mulf %217, %225 : vector<8x32xf32>
    %234 = arith.addf %232, %233 : vector<8x32xf32>
    %235 = math.tanh %234 : vector<8x32xf32>
    %236 = arith.mulf %231, %235 : vector<8x32xf32>
    %237 = arith.index_cast %c5_i32 : i32 to index
    %c0_59 = arith.constant 0 : index
    %c0_60 = arith.constant 0 : index
    %238 = vector.load %arg1[%237, %c0_59, %c0_60] : memref<8x8x32xf32, #tpu.memory_space<vmem>>, vector<1x8x32xf32>
    %239 = vector.shape_cast %238 : vector<1x8x32xf32> to vector<8x32xf32>
    %240 = arith.subf %236, %203 : vector<8x32xf32>
    %241 = arith.mulf %239, %240 : vector<8x32xf32>
    %242 = arith.addf %203, %241 : vector<8x32xf32>
    %243 = arith.subf %234, %206 : vector<8x32xf32>
    %244 = arith.mulf %239, %243 : vector<8x32xf32>
    %245 = arith.addf %206, %244 : vector<8x32xf32>
    %c6_i32 = arith.constant 6 : i32
    %246 = arith.index_cast %c6_i32 : i32 to index
    %c0_61 = arith.constant 0 : index
    %c0_62 = arith.constant 0 : index
    %247 = vector.load %arg9[%246, %c0_61, %c0_62] : memref<8x8x128xf32, #tpu.memory_space<vmem>>, vector<1x8x128xf32>
    %248 = vector.shape_cast %247 : vector<1x8x128xf32> to vector<8x128xf32>
    %cst_63 = arith.constant dense<0.000000e+00> : vector<8x128xf32>
    %249 = tpu.matmul %242, %9, %cst_63 {dimension_numbers = #tpu.dot_dimension_numbers<[1], [0], [0], [1], [0, 0, 1, 1], [], []>} : vector<8x32xf32>, vector<32x128xf32>, vector<8x128xf32> -> vector<8x128xf32>
    %250 = arith.addf %248, %249 : vector<8x128xf32>
    %251 = vector.extract_strided_slice %250 {offsets = [0, 0], sizes = [8, 32], strides = [1, 1]} : vector<8x128xf32> to vector<8x32xf32>
    %252 = arith.negf %251 : vector<8x32xf32>
    %253 = math.exp %252 : vector<8x32xf32>
    %cst_64 = arith.constant 1.000000e+00 : f32
    %254 = vector.broadcast %cst_64 : f32 to vector<8x32xf32>
    %255 = arith.addf %254, %253 : vector<8x32xf32>
    %256 = arith.divf %254, %255 : vector<8x32xf32>
    %257 = vector.extract_strided_slice %250 {offsets = [0, 32], sizes = [8, 32], strides = [1, 1]} : vector<8x128xf32> to vector<8x32xf32>
    %258 = arith.negf %257 : vector<8x32xf32>
    %259 = math.exp %258 : vector<8x32xf32>
    %cst_65 = arith.constant 1.000000e+00 : f32
    %260 = vector.broadcast %cst_65 : f32 to vector<8x32xf32>
    %261 = arith.addf %260, %259 : vector<8x32xf32>
    %262 = arith.divf %260, %261 : vector<8x32xf32>
    %263 = vector.extract_strided_slice %250 {offsets = [0, 64], sizes = [8, 32], strides = [1, 1]} : vector<8x128xf32> to vector<8x32xf32>
    %264 = math.tanh %263 : vector<8x32xf32>
    %265 = vector.extract_strided_slice %250 {offsets = [0, 96], sizes = [8, 32], strides = [1, 1]} : vector<8x128xf32> to vector<8x32xf32>
    %266 = arith.negf %265 : vector<8x32xf32>
    %267 = math.exp %266 : vector<8x32xf32>
    %cst_66 = arith.constant 1.000000e+00 : f32
    %268 = vector.broadcast %cst_66 : f32 to vector<8x32xf32>
    %269 = arith.addf %268, %267 : vector<8x32xf32>
    %270 = arith.divf %268, %269 : vector<8x32xf32>
    %271 = arith.mulf %262, %245 : vector<8x32xf32>
    %272 = arith.mulf %256, %264 : vector<8x32xf32>
    %273 = arith.addf %271, %272 : vector<8x32xf32>
    %274 = math.tanh %273 : vector<8x32xf32>
    %275 = arith.mulf %270, %274 : vector<8x32xf32>
    %276 = arith.index_cast %c6_i32 : i32 to index
    %c0_67 = arith.constant 0 : index
    %c0_68 = arith.constant 0 : index
    %277 = vector.load %arg1[%276, %c0_67, %c0_68] : memref<8x8x32xf32, #tpu.memory_space<vmem>>, vector<1x8x32xf32>
    %278 = vector.shape_cast %277 : vector<1x8x32xf32> to vector<8x32xf32>
    %279 = arith.subf %275, %242 : vector<8x32xf32>
    %280 = arith.mulf %278, %279 : vector<8x32xf32>
    %281 = arith.addf %242, %280 : vector<8x32xf32>
    %282 = arith.subf %273, %245 : vector<8x32xf32>
    %283 = arith.mulf %278, %282 : vector<8x32xf32>
    %284 = arith.addf %245, %283 : vector<8x32xf32>
    %c7_i32 = arith.constant 7 : i32
    %285 = arith.index_cast %c7_i32 : i32 to index
    %c0_69 = arith.constant 0 : index
    %c0_70 = arith.constant 0 : index
    %286 = vector.load %arg9[%285, %c0_69, %c0_70] : memref<8x8x128xf32, #tpu.memory_space<vmem>>, vector<1x8x128xf32>
    %287 = vector.shape_cast %286 : vector<1x8x128xf32> to vector<8x128xf32>
    %cst_71 = arith.constant dense<0.000000e+00> : vector<8x128xf32>
    %288 = tpu.matmul %281, %9, %cst_71 {dimension_numbers = #tpu.dot_dimension_numbers<[1], [0], [0], [1], [0, 0, 1, 1], [], []>} : vector<8x32xf32>, vector<32x128xf32>, vector<8x128xf32> -> vector<8x128xf32>
    %289 = arith.addf %287, %288 : vector<8x128xf32>
    %290 = vector.extract_strided_slice %289 {offsets = [0, 0], sizes = [8, 32], strides = [1, 1]} : vector<8x128xf32> to vector<8x32xf32>
    %291 = arith.negf %290 : vector<8x32xf32>
    %292 = math.exp %291 : vector<8x32xf32>
    %cst_72 = arith.constant 1.000000e+00 : f32
    %293 = vector.broadcast %cst_72 : f32 to vector<8x32xf32>
    %294 = arith.addf %293, %292 : vector<8x32xf32>
    %295 = arith.divf %293, %294 : vector<8x32xf32>
    %296 = vector.extract_strided_slice %289 {offsets = [0, 32], sizes = [8, 32], strides = [1, 1]} : vector<8x128xf32> to vector<8x32xf32>
    %297 = arith.negf %296 : vector<8x32xf32>
    %298 = math.exp %297 : vector<8x32xf32>
    %cst_73 = arith.constant 1.000000e+00 : f32
    %299 = vector.broadcast %cst_73 : f32 to vector<8x32xf32>
    %300 = arith.addf %299, %298 : vector<8x32xf32>
    %301 = arith.divf %299, %300 : vector<8x32xf32>
    %302 = vector.extract_strided_slice %289 {offsets = [0, 64], sizes = [8, 32], strides = [1, 1]} : vector<8x128xf32> to vector<8x32xf32>
    %303 = math.tanh %302 : vector<8x32xf32>
    %304 = vector.extract_strided_slice %289 {offsets = [0, 96], sizes = [8, 32], strides = [1, 1]} : vector<8x128xf32> to vector<8x32xf32>
    %305 = arith.negf %304 : vector<8x32xf32>
    %306 = math.exp %305 : vector<8x32xf32>
    %cst_74 = arith.constant 1.000000e+00 : f32
    %307 = vector.broadcast %cst_74 : f32 to vector<8x32xf32>
    %308 = arith.addf %307, %306 : vector<8x32xf32>
    %309 = arith.divf %307, %308 : vector<8x32xf32>
    %310 = arith.mulf %301, %284 : vector<8x32xf32>
    %311 = arith.mulf %295, %303 : vector<8x32xf32>
    %312 = arith.addf %310, %311 : vector<8x32xf32>
    %313 = math.tanh %312 : vector<8x32xf32>
    %314 = arith.mulf %309, %313 : vector<8x32xf32>
    %315 = arith.index_cast %c7_i32 : i32 to index
    %c0_75 = arith.constant 0 : index
    %c0_76 = arith.constant 0 : index
    %316 = vector.load %arg1[%315, %c0_75, %c0_76] : memref<8x8x32xf32, #tpu.memory_space<vmem>>, vector<1x8x32xf32>
    %317 = vector.shape_cast %316 : vector<1x8x32xf32> to vector<8x32xf32>
    %318 = arith.subf %314, %281 : vector<8x32xf32>
    %319 = arith.mulf %317, %318 : vector<8x32xf32>
    %320 = arith.addf %281, %319 : vector<8x32xf32>
    %321 = arith.subf %312, %284 : vector<8x32xf32>
    %322 = arith.mulf %317, %321 : vector<8x32xf32>
    %323 = arith.addf %284, %322 : vector<8x32xf32>
    %c8_i32 = arith.constant 8 : i32
    %c0_77 = arith.constant 0 : index
    %c0_78 = arith.constant 0 : index
    %324 = vector.load %arg5[%c0_77, %c0_78] : memref<32x128xf32, #tpu.memory_space<vmem>>, vector<32x128xf32>
    %cst_79 = arith.constant dense<0.000000e+00> : vector<8x128xf32>
    %325 = tpu.matmul %320, %324, %cst_79 {dimension_numbers = #tpu.dot_dimension_numbers<[1], [0], [0], [1], [0, 0, 1, 1], [], []>} : vector<8x32xf32>, vector<32x128xf32>, vector<8x128xf32> -> vector<8x128xf32>
    %c0_80 = arith.constant 0 : index
    %c0_81 = arith.constant 0 : index
    %326 = vector.load %arg6[%c0_80, %c0_81] : memref<1x128xf32, #tpu.memory_space<vmem>>, vector<1x128xf32>
    %327 = vector.broadcast %326 : vector<1x128xf32> to vector<8x128xf32>
    %328 = arith.addf %325, %327 : vector<8x128xf32>
    %329 = vector.extract_strided_slice %328 {offsets = [0, 0], sizes = [8, 8], strides = [1, 1]} : vector<8x128xf32> to vector<8x8xf32>
    %330 = vector.extract_strided_slice %328 {offsets = [0, 8], sizes = [8, 64], strides = [1, 1]} : vector<8x128xf32> to vector<8x64xf32>
    %331 = vector.shape_cast %330 : vector<8x64xf32> to vector<8x8x8xf32>
    %c0_82 = arith.constant 0 : index
    %c0_83 = arith.constant 0 : index
    %c0_84 = arith.constant 0 : index
    %332 = vector.load %arg7[%c0_82, %c0_83, %c0_84] : memref<8x3x8xf32, #tpu.memory_space<vmem>>, vector<8x3x8xf32>
    %333 = vector.shape_cast %329 : vector<8x8xf32> to vector<8x1x8xf32>
    %334 = vector.broadcast %333 : vector<8x1x8xf32> to vector<8x3x8xf32>
    %335 = arith.subf %332, %334 : vector<8x3x8xf32>
    %cst_85 = arith.constant dense<0.000000e+00> : vector<8x3x8xf32>
    %336 = tpu.matmul %335, %331, %cst_85 {dimension_numbers = #tpu.dot_dimension_numbers<[2], [1], [1], [2], [0, 0, 0, 1, 1, 2], [0], [0]>} : vector<8x3x8xf32>, vector<8x8x8xf32>, vector<8x3x8xf32> -> vector<8x3x8xf32>
    %337 = arith.mulf %336, %335 : vector<8x3x8xf32>
    %cst_86 = arith.constant dense<0.000000e+00> : vector<8x3xf32>
    %338 = vector.multi_reduction <add>, %337, %cst_86 [2] : vector<8x3x8xf32> to vector<8x3xf32>
    %cst_87 = arith.constant 0.000000e+00 : f32
    %339 = vector.broadcast %cst_87 : f32 to vector<8x3xf32>
    %340 = arith.subf %339, %338 : vector<8x3xf32>
    %cst_88 = arith.constant 0.000000e+00 : f32
    %341 = vector.broadcast %cst_88 : f32 to vector<8x125xf32>
    %342 = tpu.concatenate %340, %341 in 1 : vector<8x3xf32>, vector<8x125xf32> -> vector<8x128xf32>
    %c0_89 = arith.constant 0 : index
    %c0_90 = arith.constant 0 : index
    %343 = vector.load %arg8[%c0_89, %c0_90] : memref<8x128xf32, #tpu.memory_space<vmem>>, vector<8x128xf32>
    tpu.vector_store %arg8[%c0_89, %c0_90], %342 {strides = array<i32>} : memref<8x128xf32, #tpu.memory_space<vmem>>, vector<8x128xf32>,
    return
  }
}

</mosaic_0001>

<bundles_post_ra>
// kernel: tpu_custom_call.1
= control target key start
LH: loop header
LB: loop body
LE: loop exit
PB: predicated region body
PF: predicated region fallthrough
CT: control target
= control target key end

     0   :  { %13 = vsyncpa [#allocation4], 0  ;;  %s1943_s0 = inlined_call_operand.hbm [shape: f32[8,8,32], index: 0, kind: input, shape index: {}]   ;;  %s1944_s1 = inlined_call_operand.hbm [shape: f32[8,8,32], index: 1, kind: input, shape index: {}]   ;;  %s1945_s2 = inlined_call_operand.vmem [shape: f32[32,128], index: 2, kind: input, shape index: {}]   ;;  %s1946_s3 = inlined_call_operand.hbm [shape: f32[32,128], index: 3, kind: input, shape index: {}]   ;;  %s1947_s4 = inlined_call_operand.vmem [shape: f32[1,128], index: 4, kind: input, shape index: {}]   ;;  %s1948_s5 = inlined_call_operand.hbm [shape: f32[32,128], index: 5, kind: input, shape index: {}]   ;;  %s1949_s6 = inlined_call_operand.vmem [shape: f32[1,128], index: 6, kind: input, shape index: {}]   ;;  %s1950_s7 = inlined_call_operand.vmem [shape: f32[8,3,8], index: 7, kind: input, shape index: {}]   ;;  %s1951_s8 = inlined_call_operand.hbm [shape: f32[8,128], index: 8, kind: output, shape index: {}]  }
   0x1   :  { %14 = vsyncpa [#allocation7], 0 }
   0x2   :  { %15 = vsyncpa [#allocation10], 0 }
   0x3   :  { %16 = vsyncpa [#allocation5], 0  ;;  %s34_s29 = sshll.u32 %s1944_s1, 4  ;;  %s1622_s30 = smov [#allocation6]   ;;  %s35_s29 = int_to_ptr.hbm [resolvable:$true] %s34_s29 }
   0x4   :  { %s36_s9 = sshll.u32 %s1622_s30, 4  ;;  %s21_s12 = sshll.u32 %s1943_s0, 4  ;;  %s37_s9 = int_to_ptr.vmem [resolvable:$true] %s36_s9  ;;  %s22_s12 = int_to_ptr.hbm [resolvable:$true] %s21_s12 }
   0x5   :  { %s1623_s13 = smov 128   ;;  %s1624_s14 = smov 8  }
   0x6   :  { %42 = dma.hbm_to_vmem [thread:$0]  %s35_s29, 1024, %s37_s9, [#allocation7], %s1623_s13, %s1623_s13, %s1624_s14  }
   0x7   :  { %s1625_s15 = smov [#allocation3]   ;;  %s49_s19 = sshll.u32 %s1946_s3, 4  ;;  %s50_s19 = int_to_ptr.hbm [resolvable:$true] %s49_s19 }
   0x8   :  { %s23_s16 = sshll.u32 %s1625_s15, 4  ;;  %s64_s21 = sshll.u32 %s1948_s5, 4  ;;  %s24_s16 = int_to_ptr.vmem [resolvable:$true] %s23_s16  ;;  %s65_s21 = int_to_ptr.hbm [resolvable:$true] %s64_s21 }
   0x9   :  { %29 = dma.hbm_to_vmem [thread:$0]  %s22_s12, 1024, %s24_s16, [#allocation4], %s1623_s13, %s1623_s13, %s1624_s14  }
   0xa   :  { %s1626_s22 = smov [#allocation8]   ;;  %s1627_s0 = smov [#allocation9]  }
   0xb   :  { %s51_s23 = sshll.u32 %s1626_s22, 4  ;;  %s66_s24 = sshll.u32 %s1627_s0, 4  ;;  %s52_s23 = int_to_ptr.vmem [resolvable:$true] %s51_s23  ;;  %s67_s24 = int_to_ptr.vmem [resolvable:$true] %s66_s24 }
   0xc   :  { %57 = dma.hbm_to_vmem [thread:$0]  %s50_s19, 512, %s52_s23, [#allocation7], %s1623_s13, %s1623_s13, %s1624_s14  }
   0xd   :  { %72 = dma.hbm_to_vmem [thread:$0]  %s65_s21, 512, %s67_s24, [#allocation10], %s1623_s13, %s1623_s13, %s1624_s14  }
   0xe   :  { %1614 = dma.done.wait [#allocation4], 1024  }
   0xf   :  { %1615 = vsyncadd [#allocation4], 4294966272 }
  0x10   :  { %1616 = dma.done.wait [#allocation7], 1536  }
  0x11   :  { %1617 = vsyncadd [#allocation7], 4294965760 }
  0x12   :  { %1618 = dma.done.wait [#allocation10], 512  }
  0x13   :  { %1619 = vsyncadd [#allocation10], 4294966784  ;;  %v104_v0 = vld [vmem:[%s1945_s2 + $0x18] sm:$0xff]  ;;  %v103_v1 = vld [vmem:[%s1945_s2 + $0x10] sm:$0xff]  ;;  %vm109_vm0 = vcmask 261120   ;;  %v1628_v9 = vmov 0.0  }
  0x14   :  { %v1704_v2 = vld [vmem:[#allocation8 + $0x18] sm:$0xff]  ;;  %146 = vmatpush.msra.mxu0 %v104_v0  ;;  %v1707_v3 = vld [vmem:[#allocation8 + $0x10] sm:$0xff]  ;;  %v102_v4 = vld [vmem:[%s1945_s2 + $0x8] sm:$0xff]  ;;  %1390 = vmatpush.msra.mxu3 %v104_v0  ;;  %s1629_s10 = smov 64   ;;  %s1631_s11 = smov 96  }
  0x15   :  { %203 = vmatpush.msra.mxu1 %v1704_v2  ;;  %v1712_v5 = vld [vmem:[#allocation8 + $0x8] sm:$0xff]  ;;  %279 = vmatpush.msra.mxu2 %v1704_v2  ;;  %v101_v6 = vld [vmem:[%s1945_s2] sm:$0xff]  ;;  %s1632_s14 = smov 112   ;;  %s1633_s15 = smov 120  }
  0x16   :  { %147 = vmatpush.msra.mxu0 %v103_v1  ;;  %v1719_v7 = vld [vmem:[#allocation8] sm:$0xff]  ;;  %1391 = vmatpush.msra.mxu3 %v103_v1  ;;  %v94_v40 = vld [vmem:[#allocation3 + $0x8] sm:$0xff]  ;;  %s1634_s16 = smov 104   ;;  %s1635_s17 = smov 80  }
  0x17   :  { %204 = vmatpush.msra.mxu1 %v1707_v3  ;;  %280 = vmatpush.msra.mxu2 %v1707_v3  ;;  %v93_v8 = vld [vmem:[#allocation3] sm:$0xff]  ;;  %s1636_s18 = smov 88   ;;  %s1637_s19 = smov 72  }
  0x18   :  { %148 = vmatpush.msra.mxu0 %v102_v4  ;;  %1392 = vmatpush.msra.mxu3 %v102_v4  ;;  %v1746_v10 = vld [vmem:[%s1947_s4] ss:$0 sm:$0xff]  ;;  %s1630_s4 = smov 32  }
  0x19   :  { %205 = vmatpush.msra.mxu1 %v1712_v5  ;;  %281 = vmatpush.msra.mxu2 %v1712_v5  ;;  %v249_v35 = vld [vmem:[#allocation6] sm:$0xff] }
  0x1a   :  { %149 = vmatpush.msra.mxu0 %v101_v6  ;;  %1393 = vmatpush.msra.mxu3 %v101_v6 }
  0x1b   :  { %206 = vmatpush.msra.mxu1 %v1719_v7  ;;  %1358 = vmatmul.msk.f32.vlgmr.msra.gmra.mxu0 %vm109_vm0, %v93_v8 }
  0x1c   :  { %207 = vmatmul.f32.vlgmr.msra.gmra.mxu1 %v1628_v9  ;;  %282 = vmatpush.msra.mxu2 %v1719_v7  ;;  %v100_v9 = vld [vmem:[#allocation3 + $0x38] sm:$0xff] }
  0x1d   :  { %365 = vmatpush.msrb.mxu3 %v1704_v2  ;;  %451 = vmatpush.msrb.mxu1 %v1704_v2 }
  0x1e   :  { %537 = vmatpush.msrb.mxu2 %v1704_v2  ;;  %1365 = vmatmul.msk.f32.vlgmr.msra.gmra.mxu3 %vm109_vm0, %v100_v9 }
  0x1f   :  { %366 = vmatpush.msrb.mxu3 %v1707_v3  ;;  %452 = vmatpush.msrb.mxu1 %v1707_v3 }
  0x20   :  { %538 = vmatpush.msrb.mxu2 %v1707_v3 }
  0x21   :  { %367 = vmatpush.msrb.mxu3 %v1712_v5  ;;  %453 = vmatpush.msrb.mxu1 %v1712_v5 }
  0x22   :  { %539 = vmatpush.msrb.mxu2 %v1712_v5 }
  0x23   :  { %368 = vmatpush.msrb.mxu3 %v1719_v7  ;;  %454 = vmatpush.msrb.mxu1 %v1719_v7 }
  0x24   :  { %540 = vmatpush.msrb.mxu2 %v1719_v7  ;;  %1359 = vmatmul.msk.f32.gmra.mxu0 %vm109_vm0, %v94_v40 }
  0x25   :  { %709 = vmatpush.msra.mxu1 %v1704_v2  ;;  %623 = vmatpush.msra.mxu3 %v1704_v2 }
  0x27   :  { %710 = vmatpush.msra.mxu1 %v1707_v3  ;;  %624 = vmatpush.msra.mxu3 %v1707_v3 }
  0x29   :  { %711 = vmatpush.msra.mxu1 %v1712_v5  ;;  %625 = vmatpush.msra.mxu3 %v1712_v5 }
  0x2b   :  { %712 = vmatpush.msra.mxu1 %v1719_v7  ;;  %626 = vmatpush.msra.mxu3 %v1719_v7 }
  0x98   :  { %v151_v11 = vpop.f32.mrf.mxu0 }
  0x99   :  { %v208_v12 = vpop.f32.mrf.mxu1  ;;  %v152_v13 = vadd.f32 %v1746_v10, %v151_v11 }
  0x9b   :  { %v211_v14 = vadd.f32 %v208_v12, %v152_v13 }
  0x9d   :  { %1430 = vtanh.f32 %v211_v14  ;;  %v1366_v16 = vmul.f32 -1.442695, %v211_v14 }
  0x9f   :  { %1432 = vpow2.f32 %v1366_v16 }
  0xa1   :  { %v154_v43 = vpop.f32.mrf.mxu0 }
  0xa2   :  { %v155_v44 = vadd.f32 %v1746_v10, %v154_v43 }
  0xa3   :  { %v1431_v15 = vpop.eup %1430 }
  0xa4   :  { %234 = vrot.lane.b32.xlu0 %v1431_v15, %s1629_s10  ;;  %v330_v15 = vld [vmem:[#allocation6 + $0x8] sm:$0xff] }
  0xa5   :  { %v1433_v17 = vpop.eup %1432 }
  0xa6   :  { %v215_v18 = vadd.f32 1.0, %v1433_v17 }
  0xa8   :  { %1434 = vrcp.f32 %v215_v18  ;;  %v227_v24 = vand.u32 2147483648, %v215_v18  ;;  %vm221_vm2 = vweird.f32 %v215_v18  ;;  %v225_v25 = vand.u32 2147483647, %v215_v18 }
  0xaa   :  { %v228_v27 = vor.u32 1.1754944e-38, %v227_v24  ;;  %vm226_vm4 = vcmp.eq.f32.partialorder %v225_v25, 8.507059e+37 }
  0xae   :  { %v1435_v19 = vpop.eup %1434 }
  0xaf   :  { %v217_v20 = vmul.f32 %v1435_v19, %v215_v18  ;;  %vm222_vm1 = vweird.f32 %v1435_v19 }
  0xb0   :  { %vm223_vm3 = vmor %vm221_vm2, %vm222_vm1 }
  0xb1   :  { %v218_v21 = vsub.f32 1.0, %v217_v20 }
  0xb3   :  { %v219_v22 = vmul.f32 %v1435_v19, %v218_v21 }
  0xb5   :  { %v220_v23 = vadd.f32 %v1435_v19, %v219_v22 }
  0xb7   :  { %v224_v26 = vsel %vm223_vm3, %v1435_v19, %v220_v23  ;;  %v1786_v19 = vpop.f32.mrf.mxu3 }
  0xb8   :  { %v229_v29 = vsel %vm226_vm4, %v228_v27, %v224_v26 }
  0xb9   :  { %v232_v31 = vmul.f32 0.0, %v229_v29 }
 0x116   :  { %v235_v28 = vpop.permute.xlu0 %234 }
 0x117   :  { %v237_v30 = vmul.f32 %v235_v28, %v229_v29 }
 0x119   :  { %239 = vrot.lane.b32.xlu0 %v237_v30, %s1630_s4 }
 0x18b   :  { %v240_v32 = vpop.permute.xlu0 %239 }
 0x18c   :  { %v242_v33 = vadd.f32 %v240_v32, %v232_v31 }
 0x18e   :  { %1436 = vtanh.f32 %v242_v33  ;;  %257 = vrot.lane.b32.xlu2 %v242_v33, %s1631_s11 }
 0x194   :  { %v1437_v34 = vpop.eup %1436 }
 0x195   :  { %245 = vrot.lane.b32.xlu1 %v1437_v34, %s1629_s10 }
 0x1e8   :  { %v258_v36 = vpop.permute.xlu2 %257 }
 0x1e9   :  { %v1753_v37 = vmul.f32 %v258_v36, %v249_v35 }
 0x1eb   :  { %309 = vrot.lane.b32.xlu0 %v1753_v37, %s1630_s4 }
 0x207   :  { %v246_v38 = vpop.permute.xlu1 %245 }
 0x208   :  { %v248_v39 = vmul.f32 %v246_v38, %v229_v29 }
 0x20a   :  { %251 = vrot.lane.b32.xlu1 %v248_v39, %s1630_s4 }
 0x25d   :  { %v310_v63 = vpop.permute.xlu0 %309 }
 0x27c   :  { %v252_v41 = vpop.permute.xlu1 %251 }
 0x27d   :  { %v1759_v42 = vmul.f32 %v252_v41, %v249_v35 }
 0x27f   :  { %331 = vrot.lane.b32.xlu0 %v1759_v42, %s1631_s11  ;;  %1367 = vmatmul.msk.f32.vlgmr.msra.gmra.mxu2 %vm109_vm0, %v1759_v42 }
 0x280   :  { %795 = vmatpush.msra.mxu2 %v1704_v2  ;;  %v95_v2 = vld [vmem:[#allocation3 + $0x10] sm:$0xff] }
 0x281   :  { %1360 = vmatmul.msk.f32.gmra.mxu0 %vm109_vm0, %v95_v2 }
 0x282   :  { %796 = vmatpush.msra.mxu2 %v1707_v3 }
 0x284   :  { %797 = vmatpush.msra.mxu2 %v1712_v5 }
 0x286   :  { %798 = vmatpush.msra.mxu2 %v1719_v7 }
 0x2f1   :  { %v332_v13 = vpop.permute.xlu0 %331 }
 0x2fe   :  { %v157_v20 = vpop.f32.mrf.mxu0 }
 0x2ff   :  { %v158_v21 = vadd.f32 %v1746_v10, %v157_v20 }
 0x302   :  { %v284_v45 = vpop.f32.mrf.mxu2 }
 0x303   :  { %v287_v46 = vadd.f32 %v284_v45, %v155_v44 }
 0x305   :  { %1438 = vtanh.f32 %v287_v46  ;;  %v1368_v48 = vmul.f32 -1.442695, %v287_v46 }
 0x307   :  { %1440 = vpow2.f32 %v1368_v48 }
 0x30b   :  { %v1439_v47 = vpop.eup %1438 }
 0x30c   :  { %314 = vrot.lane.b32.xlu2 %v1439_v47, %s1629_s10 }
 0x30d   :  { %v1441_v49 = vpop.eup %1440 }
 0x30e   :  { %v291_v50 = vadd.f32 1.0, %v1441_v49 }
 0x310   :  { %1442 = vrcp.f32 %v291_v50  ;;  %v303_v56 = vand.u32 2147483648, %v291_v50  ;;  %vm297_vm6 = vweird.f32 %v291_v50  ;;  %v301_v57 = vand.u32 2147483647, %v291_v50 }
 0x312   :  { %v304_v59 = vor.u32 1.1754944e-38, %v303_v56  ;;  %vm302_vm8 = vcmp.eq.f32.partialorder %v301_v57, 8.507059e+37 }
 0x316   :  { %v1443_v51 = vpop.eup %1442 }
 0x317   :  { %v293_v52 = vmul.f32 %v1443_v51, %v291_v50  ;;  %vm298_vm5 = vweird.f32 %v1443_v51  ;;  %v416_v50 = vld [vmem:[#allocation6 + $0x10] sm:$0xff] }
 0x318   :  { %vm299_vm7 = vmor %vm297_vm6, %vm298_vm5 }
 0x319   :  { %v294_v53 = vsub.f32 1.0, %v293_v52 }
 0x31b   :  { %v295_v54 = vmul.f32 %v1443_v51, %v294_v53 }
 0x31d   :  { %v296_v55 = vadd.f32 %v1443_v51, %v295_v54  ;;  %v96_v54 = vld [vmem:[#allocation3 + $0x18] sm:$0xff] }
 0x31e   :  { %1361 = vmatmul.msk.f32.gmra.mxu0 %vm109_vm0, %v96_v54 }
 0x31f   :  { %v300_v58 = vsel %vm299_vm7, %v1443_v51, %v296_v55 }
 0x320   :  { %v305_v61 = vsel %vm302_vm8, %v304_v59, %v300_v58 }
 0x321   :  { %v312_v0 = vmul.f32 %v310_v63, %v305_v61 }
 0x366   :  { %v315_v60 = vpop.permute.xlu2 %314 }
 0x367   :  { %v317_v62 = vmul.f32 %v315_v60, %v305_v61 }
 0x369   :  { %319 = vrot.lane.b32.xlu1 %v317_v62, %s1630_s4 }
 0x39b   :  { %v160_v58 = vpop.f32.mrf.mxu0 }
 0x39c   :  { %v161_v59 = vadd.f32 %v1746_v10, %v160_v58 }
 0x3db   :  { %v320_v1 = vpop.permute.xlu1 %319 }
 0x3dc   :  { %v322_v4 = vadd.f32 %v320_v1, %v312_v0 }
 0x3de   :  { %1444 = vtanh.f32 %v322_v4  ;;  %v341_v8 = vsub.f32 %v322_v4, %v310_v63 }
 0x3e4   :  { %v1445_v6 = vpop.eup %1444 }
 0x3e5   :  { %325 = vrot.lane.b32.xlu2 %v1445_v6, %s1629_s10 }
 0x3ed   :  { %343 = vrot.lane.b32.xlu2 %v341_v8, %s1631_s11 }
 0x43f   :  { %v326_v11 = vpop.permute.xlu2 %325 }
 0x440   :  { %v328_v12 = vmul.f32 %v326_v11, %v305_v61 }
 0x442   :  { %v334_v14 = vsub.f32 %v328_v12, %v332_v13 }
 0x444   :  { %336 = vrot.lane.b32.xlu1 %v334_v14, %s1630_s4 }
 0x447   :  { %v344_v16 = vpop.permute.xlu2 %343 }
 0x448   :  { %v346_v17 = vmul.f32 %v344_v16, %v330_v15 }
 0x44a   :  { %v347_v18 = vadd.f32 %v346_v17, %v1753_v37 }
 0x44c   :  { %395 = vrot.lane.b32.xlu1 %v347_v18, %s1630_s4 }
 0x4b6   :  { %v337_v3 = vpop.permute.xlu1 %336 }
 0x4b7   :  { %v339_v5 = vmul.f32 %v337_v3, %v330_v15 }
 0x4b9   :  { %v340_v7 = vadd.f32 %v339_v5, %v1759_v42 }
 0x4bb   :  { %1369 = vmatmul.msk.f32.vlgmr.msrb.gmra.mxu3 %vm109_vm0, %v340_v7  ;;  %417 = vrot.lane.b32.xlu1 %v340_v7, %s1631_s11 }
 0x4be   :  { %v396_v40 = vpop.permute.xlu1 %395 }
 0x52d   :  { %v418_v48 = vpop.permute.xlu1 %417 }
 0x53e   :  { %v370_v22 = vpop.f32.mrf.mxu3 }
 0x53f   :  { %v373_v23 = vadd.f32 %v370_v22, %v158_v21 }
 0x541   :  { %1446 = vtanh.f32 %v373_v23  ;;  %v1370_v25 = vmul.f32 -1.442695, %v373_v23 }
 0x543   :  { %1448 = vpow2.f32 %v1370_v25 }
 0x547   :  { %v1447_v24 = vpop.eup %1446 }
 0x548   :  { %400 = vrot.lane.b32.xlu0 %v1447_v24, %s1629_s10 }
 0x549   :  { %v1449_v26 = vpop.eup %1448 }
 0x54a   :  { %v377_v27 = vadd.f32 1.0, %v1449_v26  ;;  %v502_v26 = vld [vmem:[#allocation6 + $0x18] sm:$0xff] }
 0x54c   :  { %1450 = vrcp.f32 %v377_v27  ;;  %v389_v33 = vand.u32 2147483648, %v377_v27  ;;  %vm383_vm10 = vweird.f32 %v377_v27  ;;  %v387_v34 = vand.u32 2147483647, %v377_v27 }
 0x54e   :  { %v390_v36 = vor.u32 1.1754944e-38, %v389_v33  ;;  %vm388_vm12 = vcmp.eq.f32.partialorder %v387_v34, 8.507059e+37 }
 0x552   :  { %v1451_v28 = vpop.eup %1450 }
 0x553   :  { %v379_v29 = vmul.f32 %v1451_v28, %v377_v27  ;;  %vm384_vm9 = vweird.f32 %v1451_v28 }
 0x554   :  { %vm385_vm11 = vmor %vm383_vm10, %vm384_vm9 }
 0x555   :  { %v380_v30 = vsub.f32 1.0, %v379_v29 }
 0x557   :  { %v381_v31 = vmul.f32 %v1451_v28, %v380_v30  ;;  %v97_v30 = vld [vmem:[#allocation3 + $0x20] sm:$0xff] }
 0x558   :  { %1362 = vmatmul.msk.f32.gmra.mxu0 %vm109_vm0, %v97_v30 }
 0x559   :  { %v382_v32 = vadd.f32 %v1451_v28, %v381_v31 }
 0x55b   :  { %v386_v35 = vsel %vm385_vm11, %v1451_v28, %v382_v32 }
 0x55c   :  { %v391_v38 = vsel %vm388_vm12, %v390_v36, %v386_v35 }
 0x55d   :  { %v398_v41 = vmul.f32 %v396_v40, %v391_v38 }
 0x5ba   :  { %v401_v37 = vpop.permute.xlu0 %400 }
 0x5bb   :  { %v403_v39 = vmul.f32 %v401_v37, %v391_v38 }
 0x5bd   :  { %405 = vrot.lane.b32.xlu2 %v403_v39, %s1630_s4 }
 0x5d5   :  { %v163_v34 = vpop.f32.mrf.mxu0 }
 0x5d6   :  { %v164_v35 = vadd.f32 %v1746_v10, %v163_v34 }
 0x617   :  { %v406_v42 = vpop.permute.xlu2 %405 }
 0x618   :  { %v408_v43 = vadd.f32 %v406_v42, %v398_v41 }
 0x61a   :  { %1452 = vtanh.f32 %v408_v43  ;;  %v427_v45 = vsub.f32 %v408_v43, %v396_v40 }
 0x620   :  { %v1453_v44 = vpop.eup %1452 }
 0x621   :  { %411 = vrot.lane.b32.xlu0 %v1453_v44, %s1629_s10 }
 0x629   :  { %429 = vrot.lane.b32.xlu0 %v427_v45, %s1631_s11 }
 0x693   :  { %v412_v46 = vpop.permute.xlu0 %411 }
 0x694   :  { %v414_v47 = vmul.f32 %v412_v46, %v391_v38 }
 0x696   :  { %v420_v49 = vsub.f32 %v414_v47, %v418_v48 }
 0x698   :  { %422 = vrot.lane.b32.xlu2 %v420_v49, %s1630_s4 }
 0x69b   :  { %v430_v51 = vpop.permute.xlu0 %429 }
 0x69c   :  { %v432_v52 = vmul.f32 %v430_v51, %v416_v50 }
 0x69e   :  { %v433_v53 = vadd.f32 %v432_v52, %v347_v18 }
 0x6a0   :  { %481 = vrot.lane.b32.xlu2 %v433_v53, %s1630_s4 }
 0x6f2   :  { %v423_v55 = vpop.permute.xlu2 %422 }
 0x6f3   :  { %v425_v56 = vmul.f32 %v423_v55, %v416_v50 }
 0x6f5   :  { %v426_v57 = vadd.f32 %v425_v56, %v340_v7 }
 0x6f7   :  { %1371 = vmatmul.msk.f32.vlgmr.msrb.gmra.mxu1 %vm109_vm0, %v426_v57  ;;  %503 = vrot.lane.b32.xlu2 %v426_v57, %s1631_s11 }
 0x6fa   :  { %v482_v2 = vpop.permute.xlu2 %481 }
 0x751   :  { %v504_v24 = vpop.permute.xlu2 %503 }
 0x774   :  { %v456_v60 = vpop.f32.mrf.mxu1 }
 0x775   :  { %v459_v61 = vadd.f32 %v456_v60, %v161_v59 }
 0x777   :  { %1454 = vtanh.f32 %v459_v61  ;;  %v1372_v63 = vmul.f32 -1.442695, %v459_v61 }
 0x779   :  { %1456 = vpow2.f32 %v1372_v63 }
 0x77d   :  { %v1455_v62 = vpop.eup %1454 }
 0x77e   :  { %486 = vrot.lane.b32.xlu1 %v1455_v62, %s1629_s10 }
 0x77f   :  { %v1457_v0 = vpop.eup %1456 }
 0x780   :  { %v463_v1 = vadd.f32 1.0, %v1457_v0  ;;  %v588_v0 = vld [vmem:[#allocation6 + $0x20] sm:$0xff] }
 0x782   :  { %1458 = vrcp.f32 %v463_v1  ;;  %v475_v12 = vand.u32 2147483648, %v463_v1  ;;  %vm469_vm14 = vweird.f32 %v463_v1  ;;  %v473_v13 = vand.u32 2147483647, %v463_v1 }
 0x784   :  { %v476_v15 = vor.u32 1.1754944e-38, %v475_v12  ;;  %vm474_vm1 = vcmp.eq.f32.partialorder %v473_v13, 8.507059e+37 }
 0x788   :  { %v1459_v4 = vpop.eup %1458 }
 0x789   :  { %v465_v6 = vmul.f32 %v1459_v4, %v463_v1  ;;  %vm470_vm13 = vweird.f32 %v1459_v4 }
 0x78a   :  { %vm471_vm15 = vmor %vm469_vm14, %vm470_vm13 }
 0x78b   :  { %v466_v8 = vsub.f32 1.0, %v465_v6 }
 0x78d   :  { %v467_v9 = vmul.f32 %v1459_v4, %v466_v8  ;;  %v98_v8 = vld [vmem:[#allocation3 + $0x28] sm:$0xff] }
 0x78e   :  { %1363 = vmatmul.msk.f32.gmra.mxu0 %vm109_vm0, %v98_v8 }
 0x78f   :  { %v468_v11 = vadd.f32 %v1459_v4, %v467_v9 }
 0x791   :  { %v472_v14 = vsel %vm471_vm15, %v1459_v4, %v468_v11 }
 0x792   :  { %v477_v17 = vsel %vm474_vm1, %v476_v15, %v472_v14 }
 0x793   :  { %v484_v3 = vmul.f32 %v482_v2, %v477_v17 }
 0x7f0   :  { %v487_v16 = vpop.permute.xlu1 %486 }
 0x7f1   :  { %v489_v18 = vmul.f32 %v487_v16, %v477_v17 }
 0x7f3   :  { %491 = vrot.lane.b32.xlu0 %v489_v18, %s1630_s4 }
 0x80b   :  { %v166_v13 = vpop.f32.mrf.mxu0 }
 0x80c   :  { %v167_v14 = vadd.f32 %v1746_v10, %v166_v13 }
 0x865   :  { %v492_v5 = vpop.permute.xlu0 %491 }
 0x866   :  { %v494_v7 = vadd.f32 %v492_v5, %v484_v3 }
 0x868   :  { %1460 = vtanh.f32 %v494_v7  ;;  %v513_v21 = vsub.f32 %v494_v7, %v482_v2 }
 0x86e   :  { %v1461_v20 = vpop.eup %1460 }
 0x86f   :  { %497 = vrot.lane.b32.xlu1 %v1461_v20, %s1629_s10 }
 0x877   :  { %515 = vrot.lane.b32.xlu1 %v513_v21, %s1631_s11 }
 0x8e1   :  { %v498_v22 = vpop.permute.xlu1 %497 }
 0x8e2   :  { %v500_v23 = vmul.f32 %v498_v22, %v477_v17 }
 0x8e4   :  { %v506_v25 = vsub.f32 %v500_v23, %v504_v24 }
 0x8e6   :  { %508 = vrot.lane.b32.xlu0 %v506_v25, %s1630_s4 }
 0x8e9   :  { %v516_v27 = vpop.permute.xlu1 %515 }
 0x8ea   :  { %v518_v28 = vmul.f32 %v516_v27, %v502_v26 }
 0x8ec   :  { %v519_v29 = vadd.f32 %v518_v28, %v433_v53 }
 0x8ee   :  { %567 = vrot.lane.b32.xlu0 %v519_v29, %s1630_s4 }
 0x958   :  { %v509_v31 = vpop.permute.xlu0 %508 }
 0x959   :  { %v511_v32 = vmul.f32 %v509_v31, %v502_v26 }
 0x95b   :  { %v512_v33 = vadd.f32 %v511_v32, %v426_v57 }
 0x95d   :  { %1373 = vmatmul.msk.f32.vlgmr.msrb.gmra.mxu2 %vm109_vm0, %v512_v33  ;;  %589 = vrot.lane.b32.xlu0 %v512_v33, %s1631_s11 }
 0x960   :  { %v568_v54 = vpop.permute.xlu0 %567 }
 0x9cf   :  { %v590_v62 = vpop.permute.xlu0 %589 }
 0x9e0   :  { %v542_v36 = vpop.f32.mrf.mxu2 }
 0x9e1   :  { %v545_v37 = vadd.f32 %v542_v36, %v164_v35 }
 0x9e3   :  { %1462 = vtanh.f32 %v545_v37  ;;  %v1374_v39 = vmul.f32 -1.442695, %v545_v37 }
 0x9e5   :  { %1464 = vpow2.f32 %v1374_v39 }
 0x9e9   :  { %v1463_v38 = vpop.eup %1462 }
 0x9ea   :  { %572 = vrot.lane.b32.xlu2 %v1463_v38, %s1629_s10 }
 0x9eb   :  { %v1465_v40 = vpop.eup %1464 }
 0x9ec   :  { %v549_v41 = vadd.f32 1.0, %v1465_v40  ;;  %v674_v40 = vld [vmem:[#allocation6 + $0x28] sm:$0xff] }
 0x9ee   :  { %1466 = vrcp.f32 %v549_v41  ;;  %v561_v47 = vand.u32 2147483648, %v549_v41  ;;  %vm555_vm3 = vweird.f32 %v549_v41  ;;  %v559_v48 = vand.u32 2147483647, %v549_v41 }
 0x9f0   :  { %v562_v50 = vor.u32 1.1754944e-38, %v561_v47  ;;  %vm560_vm5 = vcmp.eq.f32.partialorder %v559_v48, 8.507059e+37 }
 0x9f4   :  { %v1467_v42 = vpop.eup %1466 }
 0x9f5   :  { %v551_v43 = vmul.f32 %v1467_v42, %v549_v41  ;;  %vm556_vm2 = vweird.f32 %v1467_v42 }
 0x9f6   :  { %vm557_vm4 = vmor %vm555_vm3, %vm556_vm2  ;;  %vm1077_vm3 = vcmask 64512  }
 0x9f7   :  { %v552_v44 = vsub.f32 1.0, %v551_v43 }
 0x9f9   :  { %v553_v45 = vmul.f32 %v1467_v42, %v552_v44  ;;  %v99_v44 = vld [vmem:[#allocation3 + $0x30] sm:$0xff] }
 0x9fa   :  { %1364 = vmatmul.msk.f32.gmra.mxu0 %vm109_vm0, %v99_v44 }
 0x9fb   :  { %v554_v46 = vadd.f32 %v1467_v42, %v553_v45 }
 0x9fd   :  { %v558_v49 = vsel %vm557_vm4, %v1467_v42, %v554_v46  ;;  %vm1270_vm4 = vcmask 59392  }
 0x9fe   :  { %v563_v52 = vsel %vm560_vm5, %v562_v50, %v558_v49  ;;  %vm1321_vm5 = vcmask 1041409  }
 0x9ff   :  { %v570_v55 = vmul.f32 %v568_v54, %v563_v52 }
 0xa44   :  { %v573_v51 = vpop.permute.xlu2 %572 }
 0xa45   :  { %v575_v53 = vmul.f32 %v573_v51, %v563_v52 }
 0xa47   :  { %577 = vrot.lane.b32.xlu1 %v575_v53, %s1630_s4 }
 0xa77   :  { %v169_v48 = vpop.f32.mrf.mxu0 }
 0xa78   :  { %v170_v49 = vadd.f32 %v1746_v10, %v169_v48 }
 0xab9   :  { %v578_v56 = vpop.permute.xlu1 %577 }
 0xaba   :  { %v580_v57 = vadd.f32 %v578_v56, %v570_v55 }
 0xabc   :  { %1468 = vtanh.f32 %v580_v57  ;;  %v599_v59 = vsub.f32 %v580_v57, %v568_v54 }
 0xac2   :  { %v1469_v58 = vpop.eup %1468 }
 0xac3   :  { %583 = vrot.lane.b32.xlu2 %v1469_v58, %s1629_s10 }
 0xacb   :  { %601 = vrot.lane.b32.xlu2 %v599_v59, %s1631_s11 }
 0xb1d   :  { %v584_v60 = vpop.permute.xlu2 %583 }
 0xb1e   :  { %v586_v61 = vmul.f32 %v584_v60, %v563_v52 }
 0xb20   :  { %v592_v63 = vsub.f32 %v586_v61, %v590_v62 }
 0xb22   :  { %594 = vrot.lane.b32.xlu1 %v592_v63, %s1630_s4 }
 0xb25   :  { %v602_v1 = vpop.permute.xlu2 %601 }
 0xb26   :  { %v604_v4 = vmul.f32 %v602_v1, %v588_v0 }
 0xb28   :  { %v605_v6 = vadd.f32 %v604_v4, %v519_v29 }
 0xb2a   :  { %653 = vrot.lane.b32.xlu1 %v605_v6, %s1630_s4 }
 0xb94   :  { %v595_v9 = vpop.permute.xlu1 %594 }
 0xb95   :  { %v597_v11 = vmul.f32 %v595_v9, %v588_v0 }
 0xb97   :  { %v598_v12 = vadd.f32 %v597_v11, %v512_v33 }
 0xb99   :  { %1375 = vmatmul.msk.f32.vlgmr.msra.gmra.mxu3 %vm109_vm0, %v598_v12  ;;  %675 = vrot.lane.b32.xlu1 %v598_v12, %s1631_s11 }
 0xb9c   :  { %v654_v30 = vpop.permute.xlu1 %653 }
 0xc0b   :  { %v676_v38 = vpop.permute.xlu1 %675 }
 0xc1c   :  { %v628_v15 = vpop.f32.mrf.mxu3 }
 0xc1d   :  { %v631_v16 = vadd.f32 %v628_v15, %v167_v14 }
 0xc1f   :  { %1470 = vtanh.f32 %v631_v16  ;;  %v1376_v18 = vmul.f32 -1.442695, %v631_v16 }
 0xc21   :  { %1472 = vpow2.f32 %v1376_v18 }
 0xc25   :  { %v1471_v17 = vpop.eup %1470 }
 0xc26   :  { %658 = vrot.lane.b32.xlu0 %v1471_v17, %s1629_s10 }
 0xc27   :  { %v1473_v2 = vpop.eup %1472 }
 0xc28   :  { %v635_v3 = vadd.f32 1.0, %v1473_v2  ;;  %v760_v2 = vld [vmem:[#allocation6 + $0x30] sm:$0xff] }
 0xc2a   :  { %1474 = vrcp.f32 %v635_v3  ;;  %v647_v23 = vand.u32 2147483648, %v635_v3  ;;  %vm641_vm7 = vweird.f32 %v635_v3  ;;  %v645_v24 = vand.u32 2147483647, %v635_v3 }
 0xc2c   :  { %v648_v26 = vor.u32 1.1754944e-38, %v647_v23  ;;  %vm646_vm9 = vcmp.eq.f32.partialorder %v645_v24, 8.507059e+37  ;;  %v173_v23 = vadd.f32 %v1746_v10, %v1786_v19 }
 0xc30   :  { %v1475_v5 = vpop.eup %1474 }
 0xc31   :  { %v637_v7 = vmul.f32 %v1475_v5, %v635_v3  ;;  %vm642_vm6 = vweird.f32 %v1475_v5 }
 0xc32   :  { %vm643_vm8 = vmor %vm641_vm7, %vm642_vm6  ;;  %vm1323_vm6 = vcmask 1042434   ;;  %vm1325_vm7 = vcmask 1043459  }
 0xc33   :  { %v638_v20 = vsub.f32 1.0, %v637_v7 }
 0xc35   :  { %v639_v21 = vmul.f32 %v1475_v5, %v638_v20 }
 0xc37   :  { %v640_v22 = vadd.f32 %v1475_v5, %v639_v21 }
 0xc39   :  { %v644_v25 = vsel %vm643_vm8, %v1475_v5, %v640_v22  ;;  %vm1327_vm8 = vcmask 1044484  }
 0xc3a   :  { %v649_v28 = vsel %vm646_vm9, %v648_v26, %v644_v25  ;;  %vm1329_vm9 = vcmask 1045509  }
 0xc3b   :  { %v656_v31 = vmul.f32 %v654_v30, %v649_v28 }
 0xc98   :  { %v659_v27 = vpop.permute.xlu0 %658 }
 0xc99   :  { %v661_v29 = vmul.f32 %v659_v27, %v649_v28 }
 0xc9b   :  { %663 = vrot.lane.b32.xlu2 %v661_v29, %s1630_s4 }
 0xcf5   :  { %v664_v32 = vpop.permute.xlu2 %663 }
 0xcf6   :  { %v666_v33 = vadd.f32 %v664_v32, %v656_v31 }
 0xcf8   :  { %1476 = vtanh.f32 %v666_v33  ;;  %v685_v35 = vsub.f32 %v666_v33, %v654_v30 }
 0xcfe   :  { %v1477_v34 = vpop.eup %1476 }
 0xcff   :  { %669 = vrot.lane.b32.xlu0 %v1477_v34, %s1629_s10 }
 0xd07   :  { %687 = vrot.lane.b32.xlu0 %v685_v35, %s1631_s11 }
 0xd71   :  { %v670_v36 = vpop.permute.xlu0 %669 }
 0xd72   :  { %v672_v37 = vmul.f32 %v670_v36, %v649_v28 }
 0xd74   :  { %v678_v39 = vsub.f32 %v672_v37, %v676_v38 }
 0xd76   :  { %680 = vrot.lane.b32.xlu2 %v678_v39, %s1630_s4 }
 0xd79   :  { %v688_v41 = vpop.permute.xlu0 %687 }
 0xd7a   :  { %v690_v42 = vmul.f32 %v688_v41, %v674_v40 }
 0xd7c   :  { %v691_v43 = vadd.f32 %v690_v42, %v605_v6 }
 0xd7e   :  { %739 = vrot.lane.b32.xlu2 %v691_v43, %s1630_s4 }
 0xdd0   :  { %v681_v45 = vpop.permute.xlu2 %680 }
 0xdd1   :  { %v683_v46 = vmul.f32 %v681_v45, %v674_v40  ;;  %v860_v45 = vld [vmem:[#allocation9 + $0x18] sm:$0xff] }
 0xdd2   :  { %880 = vmatpush.msrb.mxu3 %v860_v45 }
 0xdd3   :  { %v684_v47 = vadd.f32 %v683_v46, %v598_v12  ;;  %v859_v46 = vld [vmem:[#allocation9 + $0x10] sm:$0xff] }
 0xdd4   :  { %881 = vmatpush.msrb.mxu3 %v859_v46 }
 0xdd5   :  { %1377 = vmatmul.msk.f32.vlgmr.msra.gmra.mxu1 %vm109_vm0, %v684_v47  ;;  %761 = vrot.lane.b32.xlu2 %v684_v47, %s1631_s11 }
 0xdd8   :  { %v740_v8 = vpop.permute.xlu2 %739 }
 0xe2f   :  { %v762_v17 = vpop.permute.xlu2 %761 }
 0xe52   :  { %v714_v50 = vpop.f32.mrf.mxu1 }
 0xe53   :  { %v717_v51 = vadd.f32 %v714_v50, %v170_v49 }
 0xe55   :  { %1478 = vtanh.f32 %v717_v51  ;;  %v1378_v53 = vmul.f32 -1.442695, %v717_v51  ;;  %v858_v51 = vld [vmem:[#allocation9 + $0x8] sm:$0xff] }
 0xe56   :  { %882 = vmatpush.msrb.mxu3 %v858_v51 }
 0xe57   :  { %1480 = vpow2.f32 %v1378_v53  ;;  %v846_v53 = vld [vmem:[#allocation6 + $0x38] sm:$0xff] }
 0xe5b   :  { %v1479_v52 = vpop.eup %1478 }
 0xe5c   :  { %744 = vrot.lane.b32.xlu1 %v1479_v52, %s1629_s10  ;;  %v857_v52 = vld [vmem:[#allocation9] sm:$0xff] }
 0xe5d   :  { %v1481_v54 = vpop.eup %1480  ;;  %883 = vmatpush.msrb.mxu3 %v857_v52 }
 0xe5e   :  { %v721_v55 = vadd.f32 1.0, %v1481_v54 }
 0xe60   :  { %1482 = vrcp.f32 %v721_v55  ;;  %v733_v61 = vand.u32 2147483648, %v721_v55  ;;  %vm727_vm11 = vweird.f32 %v721_v55  ;;  %v731_v62 = vand.u32 2147483647, %v721_v55 }
 0xe62   :  { %v734_v0 = vor.u32 1.1754944e-38, %v733_v61  ;;  %vm732_vm13 = vcmp.eq.f32.partialorder %v731_v62, 8.507059e+37 }
 0xe66   :  { %v1483_v56 = vpop.eup %1482 }
 0xe67   :  { %v723_v57 = vmul.f32 %v1483_v56, %v721_v55  ;;  %vm728_vm10 = vweird.f32 %v1483_v56 }
 0xe68   :  { %vm729_vm12 = vmor %vm727_vm11, %vm728_vm10  ;;  %vm1331_vm10 = vcmask 1046534   ;;  %vm1333_vm11 = vcmask 1047559  }
 0xe69   :  { %v724_v58 = vsub.f32 1.0, %v723_v57  ;;  %v1429_v57 = vld [vmem:[%s1949_s6] ss:$0 sm:$0xff] }
 0xe6b   :  { %v725_v59 = vmul.f32 %v1483_v56, %v724_v58 }
 0xe6d   :  { %v726_v60 = vadd.f32 %v1483_v56, %v725_v59 }
 0xe6f   :  { %v730_v63 = vsel %vm729_vm12, %v1483_v56, %v726_v60  ;;  %vm1336_vm12 = vcmask 23552  }
 0xe70   :  { %v735_v4 = vsel %vm732_vm13, %v734_v0, %v730_v63 }
 0xe71   :  { %v742_v9 = vmul.f32 %v740_v8, %v735_v4 }
 0xece   :  { %v745_v1 = vpop.permute.xlu1 %744 }
 0xecf   :  { %v747_v6 = vmul.f32 %v745_v1, %v735_v4 }
 0xed1   :  { %749 = vrot.lane.b32.xlu0 %v747_v6, %s1630_s4 }
 0xf43   :  { %v750_v11 = vpop.permute.xlu0 %749 }
 0xf44   :  { %v752_v12 = vadd.f32 %v750_v11, %v742_v9 }
 0xf46   :  { %1484 = vtanh.f32 %v752_v12  ;;  %v771_v14 = vsub.f32 %v752_v12, %v740_v8  ;;  %v1638_v12 = vmov 1983009808  }
 0xf4c   :  { %v1485_v13 = vpop.eup %1484 }
 0xf4d   :  { %755 = vrot.lane.b32.xlu1 %v1485_v13, %s1629_s10  ;;  %v931_v13 = vunpack.c.l.s4 %v1638_v12  ;;  %v1038_v12 = vld [vmem:[%s1950_s7] sm:$0x7] }
 0xf55   :  { %773 = vrot.lane.b32.xlu1 %v771_v14, %s1631_s11 }
 0xfbf   :  { %v756_v15 = vpop.permute.xlu1 %755 }
 0xfc0   :  { %v758_v16 = vmul.f32 %v756_v15, %v735_v4 }
 0xfc2   :  { %v764_v18 = vsub.f32 %v758_v16, %v762_v17 }
 0xfc4   :  { %766 = vrot.lane.b32.xlu0 %v764_v18, %s1630_s4  ;;  %v932_v18 = vunpack.c.0.s8 %v931_v13 }
 0xfc7   :  { %v774_v3 = vpop.permute.xlu1 %773 }
 0xfc8   :  { %v776_v5 = vmul.f32 %v774_v3, %v760_v2 }
 0xfca   :  { %v777_v7 = vadd.f32 %v776_v5, %v691_v43 }
 0xfcc   :  { %825 = vrot.lane.b32.xlu0 %v777_v7, %s1630_s4 }
0x1036   :  { %v767_v20 = vpop.permute.xlu0 %766 }
0x1037   :  { %v769_v21 = vmul.f32 %v767_v20, %v760_v2 }
0x1039   :  { %v770_v22 = vadd.f32 %v769_v21, %v684_v47 }
0x103b   :  { %1379 = vmatmul.msk.f32.vlgmr.msra.gmra.mxu2 %vm109_vm0, %v770_v22  ;;  %847 = vrot.lane.b32.xlu0 %v770_v22, %s1631_s11 }
0x103e   :  { %v826_v40 = vpop.permute.xlu0 %825 }
0x10ad   :  { %v848_v49 = vpop.permute.xlu0 %847 }
0x10be   :  { %v800_v24 = vpop.f32.mrf.mxu2 }
0x10bf   :  { %v803_v25 = vadd.f32 %v800_v24, %v173_v23  ;;  %v1039_v24 = vld [vmem:[%s1950_s7 + $0x4] sm:$0x7] }
0x10c1   :  { %1486 = vtanh.f32 %v803_v25  ;;  %v1380_v27 = vmul.f32 -1.442695, %v803_v25 }
0x10c3   :  { %1488 = vpow2.f32 %v1380_v27 }
0x10c7   :  { %v1487_v26 = vpop.eup %1486 }
0x10c8   :  { %830 = vrot.lane.b32.xlu2 %v1487_v26, %s1629_s10 }
0x10c9   :  { %v1489_v28 = vpop.eup %1488 }
0x10ca   :  { %v807_v29 = vadd.f32 1.0, %v1489_v28  ;;  %v1639_v28 = vmov 1934713408  }
0x10cc   :  { %1490 = vrcp.f32 %v807_v29  ;;  %v819_v35 = vand.u32 2147483648, %v807_v29  ;;  %vm813_vm15 = vweird.f32 %v807_v29  ;;  %v817_v10 = vand.u32 2147483647, %v807_v29 }
0x10ce   :  { %v820_v36 = vor.u32 1.1754944e-38, %v819_v35  ;;  %vm818_vm2 = vcmp.eq.f32.partialorder %v817_v10, 8.507059e+37 }
0x10d2   :  { %v1491_v30 = vpop.eup %1490 }
0x10d3   :  { %v809_v31 = vmul.f32 %v1491_v30, %v807_v29  ;;  %vm814_vm14 = vweird.f32 %v1491_v30  ;;  %v979_v29 = vunpack.c.l.s4 %v1639_v28 }
0x10d4   :  { %vm815_vm1 = vmor %vm813_vm15, %vm814_vm14 }
0x10d5   :  { %v810_v32 = vsub.f32 1.0, %v809_v31 }
0x10d7   :  { %v811_v33 = vmul.f32 %v1491_v30, %v810_v32 }
0x10d9   :  { %v812_v34 = vadd.f32 %v1491_v30, %v811_v33 }
0x10db   :  { %v816_v19 = vsel %vm815_vm1, %v1491_v30, %v812_v34 }
0x10dc   :  { %v821_v38 = vsel %vm818_vm2, %v820_v36, %v816_v19 }
0x10dd   :  { %v828_v41 = vmul.f32 %v826_v40, %v821_v38 }
0x1122   :  { %v831_v37 = vpop.permute.xlu2 %830 }
0x1123   :  { %v833_v39 = vmul.f32 %v831_v37, %v821_v38 }
0x1125   :  { %835 = vrot.lane.b32.xlu1 %v833_v39, %s1630_s4 }
0x1197   :  { %v836_v42 = vpop.permute.xlu1 %835 }
0x1198   :  { %v838_v43 = vadd.f32 %v836_v42, %v828_v41 }
0x119a   :  { %1492 = vtanh.f32 %v838_v43 }
0x11a0   :  { %v1493_v44 = vpop.eup %1492 }
0x11a1   :  { %841 = vrot.lane.b32.xlu2 %v1493_v44, %s1629_s10 }
0x11fb   :  { %v842_v47 = vpop.permute.xlu2 %841 }
0x11fc   :  { %v844_v48 = vmul.f32 %v842_v47, %v821_v38  ;;  %v980_v47 = vunpack.c.0.s8 %v979_v29 }
0x11fe   :  { %v850_v50 = vsub.f32 %v844_v48, %v848_v49 }
0x1200   :  { %852 = vrot.lane.b32.xlu1 %v850_v50, %s1630_s4  ;;  %s1346_s4 = sshll.u32 %s1951_s8, 4  ;;  %s1347_s4 = int_to_ptr.hbm [resolvable:$true] %s1346_s4 }
0x1272   :  { %v853_v54 = vpop.permute.xlu1 %852 }
0x1273   :  { %v855_v55 = vmul.f32 %v853_v54, %v846_v53 }
0x1275   :  { %v856_v56 = vadd.f32 %v855_v55, %v770_v22 }
0x1277   :  { %1381 = vmatmul.msk.f32.vlgmr.msrb.gmra.mxu3 %vm109_vm0, %v856_v56  ;;  %vm926_vm0 = vcmask 1047556  }
0x12fa   :  { %v885_v58 = vpop.f32.mrf.mxu3 }
0x12fb   :  { %v1847_v59 = vadd.f32 %v1429_v57, %v885_v58 }
0x12fd   :  { %891 = vrot.lane.b32.xlu1 %v1847_v59, %s1632_s14  ;;  %889 = vrot.lane.b32.xlu0 %v1847_v59, %s1633_s15  ;;  %v1046_v14 = vrot.slane %v1847_v59, 1  ;;  %v1053_v16 = vperm.slane %v1847_v59, 0  ;;  %v1047_v17 = vrot.slane %v1847_v59, 2  ;;  %v1049_v7 = vrot.slane %v1847_v59, 4 }
0x12fe   :  { %893 = vrot.lane.b32.xlu2 %v1847_v59, %s1634_s16 }
0x12ff   :  { %v1054_v5 = vperm.slane %v1046_v14, 0  ;;  %v1868_v19 = vperm.slane %v1047_v17, 0 }
0x1301   :  { %v1866_v10 = vsub.f32 %v1039_v24, %v1054_v5 }
0x1305   :  { %899 = vrot.lane.b32.xlu1 %v1847_v59, %s1635_s17  ;;  %897 = vrot.lane.b32.xlu0 %v1847_v59, %s1636_s18 }
0x1306   :  { %901 = vrot.lane.b32.xlu2 %v1847_v59, %s1637_s19 }
0x130e   :  { %895 = vrot.lane.b32.xlu2 %v1847_v59, %s1631_s11 }
0x1358   :  { %v894_v60 = vpop.permute.xlu2 %893 }
0x1360   :  { %v902_v61 = vpop.permute.xlu2 %901 }
0x1368   :  { %v896_v9 = vpop.permute.xlu2 %895 }
0x136f   :  { %v892_v62 = vpop.permute.xlu1 %891  ;;  %v890_v63 = vpop.permute.xlu0 %889 }
0x1370   :  { %v1418_v0 = vpack.i.bf16 %v902_v61, %v892_v62  ;;  %v1413_v1 = vpack.i.bf16 %v890_v63, %v894_v60  ;;  %v928_v25 = vrot.slane %v890_v63, 4 }
0x1372   :  { %1414 = vrot.lane.b32.xlu0 %v1413_v1, %s1633_s15  ;;  %1419 = vrot.lane.b32.xlu1 %v1418_v0, %s1633_s15 }
0x1377   :  { %v900_v4 = vpop.permute.xlu1 %899  ;;  %v898_v6 = vpop.permute.xlu0 %897 }
0x1378   :  { %v1423_v8 = vpack.i.bf16 %v900_v4, %v898_v6 }
0x137a   :  { %1424 = vrot.lane.b32.xlu2 %v1423_v8, %s1633_s15  ;;  %909 = vrot.lane.b32.xlu0 %v896_v9, %s1633_s15 }
0x13d4   :  { %v1425_v11 = vpop.permute.xlu2 %1424 }
0x13d5   :  { %v1426_v15 = vunpack.i.l.bf16 %v1425_v11  ;;  %v1427_v26 = vunpack.i.h.bf16 %v1425_v11 }
0x13d7   :  { %v964_v27 = vrot.slane %v1426_v15, 4  ;;  %v950_v44 = vrot.slane %v1427_v26, 4 }
0x13e4   :  { %v1415_v2 = vpop.permute.xlu0 %1414  ;;  %v1420_v3 = vpop.permute.xlu1 %1419 }
0x13e5   :  { %v1417_v20 = vunpack.i.h.bf16 %v1415_v2  ;;  %v1416_v21 = vunpack.i.l.bf16 %v1415_v2  ;;  %v1422_v22 = vunpack.i.h.bf16 %v1420_v3  ;;  %v1421_v23 = vunpack.i.l.bf16 %v1420_v3 }
0x13e7   :  { %v940_v30 = vrot.slane %v1417_v20, 4  ;;  %v938_v31 = vrot.slane %v1416_v21, 4  ;;  %v962_v32 = vrot.slane %v1422_v22, 4  ;;  %v925_v33 = vrot.slane %v1421_v23, 4 }
0x13e8   :  { %v929_v34 = vsel %vm926_vm0, %v1421_v23, %v928_v25  ;;  %v965_v35 = vsel %vm926_vm0, %v1422_v22, %v964_v27  ;;  %v1069_v22 = vsub.f32 %v1038_v12, %v1053_v16  ;;  %v1040_v23 = vld [vmem:[%s1950_s7 + $0x8] sm:$0x7]  ;;  %v1048_v25 = vrot.slane %v1847_v59, 3 }
0x13e9   :  { %v939_v36 = vsel %vm926_vm0, %v938_v31, %v1417_v20  ;;  %v941_v37 = vsel %vm926_vm0, %v1416_v21, %v940_v30  ;;  %v927_v38 = vsel %vm926_vm0, %v925_v33, %v890_v63  ;;  %v937_v39 = vperm.slane %v929_v34, %v932_v18 }
0x13ea   :  { %v945_v40 = vperm.slane %v939_v36, %v932_v18  ;;  %v949_v41 = vperm.slane %v941_v37, %v932_v18  ;;  %v933_v42 = vperm.slane %v927_v38, %v932_v18  ;;  %v963_v43 = vsel %vm926_vm0, %v962_v32, %v1426_v15 }
0x13eb   :  { %v969_v45 = vperm.slane %v963_v43, %v932_v18  ;;  %v973_v46 = vperm.slane %v965_v35, %v932_v18  ;;  %v988_v51 = vrot.slane %v937_v39, 4  ;;  %v1057_v31 = vperm.slane %v1049_v7, 0  ;;  %v1042_v7 = vld [vmem:[%s1950_s7 + $0x10] sm:$0x7] }
0x13ec   :  { %v974_v48 = vrot.slane %v945_v40, 4  ;;  %v986_v49 = vrot.slane %v949_v41, 4  ;;  %v976_v50 = vrot.slane %v933_v42, 4  ;;  %v910_v52 = vpop.permute.xlu0 %909  ;;  %v1050_v32 = vrot.slane %v1847_v59, 5 }
0x13ed   :  { %v998_v53 = vrot.slane %v969_v45, 4  ;;  %v951_v54 = vsel %vm926_vm0, %v950_v44, %v910_v52  ;;  %v952_v55 = vrot.slane %v910_v52, 4  ;;  %v1010_v61 = vrot.slane %v973_v46, 4  ;;  %v1044_v52 = vld [vmem:[%s1950_s7 + $0x18] sm:$0x7] }
0x13ee   :  { %v957_v56 = vperm.slane %v951_v54, %v932_v18  ;;  %v975_v57 = vsel %vm926_vm0, %v974_v48, %v933_v42  ;;  %v977_v58 = vsel %vm926_vm0, %v945_v40, %v976_v50  ;;  %v987_v60 = vsel %vm926_vm0, %v986_v49, %v937_v39  ;;  %v1045_v50 = vld [vmem:[%s1950_s7 + $0x1c] sm:$0x7] }
0x13ef   :  { %v953_v62 = vsel %vm926_vm0, %v1427_v26, %v952_v55  ;;  %v981_v63 = vperm.slane %v975_v57, %v980_v47  ;;  %v985_v0 = vperm.slane %v977_v58, %v980_v47  ;;  %v989_v8 = vsel %vm926_vm0, %v949_v41, %v988_v51  ;;  %v1041_v41 = vld [vmem:[%s1950_s7 + $0xc] sm:$0x7] }
0x13f0   :  { %v961_v1 = vperm.slane %v953_v62, %v932_v18  ;;  %v999_v4 = vsel %vm926_vm0, %v998_v53, %v957_v56  ;;  %v1000_v6 = vrot.slane %v957_v56, 4  ;;  %v993_v14 = vperm.slane %v987_v60, %v980_v47 }
0x13f1   :  { %v1005_v9 = vperm.slane %v999_v4, %v980_v47  ;;  %v1024_v11 = vrot.slane %v981_v63, 4  ;;  %v1028_v13 = vrot.slane %v985_v0, 4  ;;  %v997_v3 = vperm.slane %v989_v8, %v980_v47 }
0x13f2   :  { %v1012_v15 = vrot.slane %v961_v1, 4  ;;  %v1001_v17 = vsel %vm926_vm0, %v969_v45, %v1000_v6  ;;  %v1011_v2 = vsel %vm926_vm0, %v1010_v61, %v961_v1  ;;  %v1071_v35 = vsub.f32 %v1040_v23, %v1868_v19  ;;  %v1043_v45 = vld [vmem:[%s1950_s7 + $0x14] sm:$0x7]  ;;  %s1640_s7 = smov [#allocation11]  }
0x13f3   :  { %v1025_v18 = vsel %vm926_vm0, %v1005_v9, %v1024_v11  ;;  %v1022_v5 = vrot.slane %v1005_v9, 4  ;;  %v1009_v20 = vperm.slane %v1001_v17, %v980_v47  ;;  %v1017_v21 = vperm.slane %v1011_v2, %v980_v47  ;;  %s1344_s2 = sshll.u32 %s1640_s7, 4  ;;  %s1345_s2 = int_to_ptr.vmem [resolvable:$true] %s1344_s2 }
0x13f4   :  { %1119 = vmatpush.msrb.mxu2 %v1025_v18  ;;  %v1013_v24 = vsel %vm926_vm0, %v973_v46, %v1012_v15  ;;  %v1036_v16 = vrot.slane %v997_v3, 4  ;;  %v1032_v36 = vrot.slane %v993_v14, 4  ;;  %v1056_v40 = vperm.slane %v1048_v25, 0 }
0x13f5   :  { %1383 = vmatmul.msk.f32.vlgmr.msrb.gmra.mxu2 %vm1077_vm3, %v1866_v10  ;;  %v1023_v26 = vsel %vm926_vm0, %v1022_v5, %v981_v63  ;;  %v1029_v27 = vsel %vm926_vm0, %v1009_v20, %v1028_v13  ;;  %v1026_v28 = vrot.slane %v1009_v20, 4  ;;  %v1030_v29 = vrot.slane %v1017_v21, 4 }
0x13f6   :  { %1096 = vmatpush.msrb.mxu1 %v1023_v26  ;;  %v1021_v30 = vperm.slane %v1013_v24, %v980_v47  ;;  %v1033_v39 = vsel %vm926_vm0, %v1017_v21, %v1032_v36  ;;  %v1073_v42 = vsub.f32 %v1042_v7, %v1057_v31  ;;  %v1058_v43 = vperm.slane %v1050_v32, 0 }
0x13f7   :  { %1382 = vmatmul.msk.f32.vlgmr.msrb.gmra.mxu1 %vm1077_vm3, %v1069_v22  ;;  %v1027_v33 = vsel %vm926_vm0, %v1026_v28, %v985_v0  ;;  %v1031_v34 = vsel %vm926_vm0, %v1030_v29, %v993_v14  ;;  %v1052_v44 = vrot.slane %v1847_v59, 7  ;;  %v1072_v46 = vsub.f32 %v1041_v41, %v1056_v40 }
0x13f8   :  { %1165 = vmatpush.msra.mxu1 %v1029_v27  ;;  %1142 = vmatpush.msra.mxu3 %v1027_v33  ;;  %v1037_v37 = vsel %vm926_vm0, %v1021_v30, %v1036_v16  ;;  %v1034_v38 = vrot.slane %v1021_v30, 4  ;;  %v1051_v47 = vrot.slane %v1847_v59, 6  ;;  %v1074_v48 = vsub.f32 %v1043_v45, %v1058_v43 }
0x13f9   :  { %1188 = vmatpush.msra.mxu2 %v1031_v34  ;;  %1384 = vmatmul.msk.f32.vlgmr.msra.gmra.mxu3 %vm1077_vm3, %v1071_v35  ;;  %v1060_v49 = vperm.slane %v1052_v44, 0  ;;  %v1311_v21 = vlaneseq }
0x13fa   :  { %1211 = vmatpush.msrb.mxu3 %v1033_v39  ;;  %v1035_v19 = vsel %vm926_vm0, %v1034_v38, %v997_v3  ;;  %v1059_v51 = vperm.slane %v1051_v47, 0 }
0x13fb   :  { %1257 = vmatpush.msrb.mxu2 %v1037_v37  ;;  %1234 = vmatpush.msrb.mxu1 %v1035_v19  ;;  %v1076_v53 = vsub.f32 %v1045_v50, %v1060_v49  ;;  %v1312_v26 = vand.u32 127, %v1311_v21 }
0x13fc   :  { %v1075_v54 = vsub.f32 %v1044_v52, %v1059_v51 }
0x13fd   :  { %1386 = vmatmul.msk.f32.vlgmr.msra.gmra.mxu2 %vm1077_vm3, %v1073_v42 }
0x13ff   :  { %1385 = vmatmul.msk.f32.vlgmr.msra.gmra.mxu1 %vm1077_vm3, %v1072_v46 }
0x1401   :  { %1387 = vmatmul.msk.f32.vlgmr.msrb.gmra.mxu3 %vm1077_vm3, %v1074_v48 }
0x1405   :  { %1389 = vmatmul.msk.f32.vlgmr.msrb.gmra.mxu2 %vm1077_vm3, %v1076_v53 }
0x1407   :  { %1388 = vmatmul.msk.f32.vlgmr.msrb.gmra.mxu1 %vm1077_vm3, %v1075_v54 }
0x1474   :  { %v1098_v59 = vpop.f32.mrf.mxu1 }
0x1475   :  { %v1262_v55 = vmul.f32 %v1098_v59, %v1069_v22 }
0x1477   :  { %v1271_v56 = vsel %vm1270_vm4, %v1262_v55, 0.0 }
0x1478   :  { %1272 = vadd.xlane.f32.xlu1 %v1271_v56  ;;  %v1121_v57 = vpop.f32.mrf.mxu2 }
0x1479   :  { %v1263_v58 = vmul.f32 %v1121_v57, %v1866_v10 }
0x147b   :  { %v1274_v60 = vsel %vm1270_vm4, %v1263_v58, 0.0 }
0x147c   :  { %v1144_v61 = vpop.f32.mrf.mxu3  ;;  %v1167_v62 = vpop.f32.mrf.mxu1  ;;  %1275 = vadd.xlane.f32.xlu2 %v1274_v60 }
0x147d   :  { %v1264_v63 = vmul.f32 %v1144_v61, %v1071_v35  ;;  %v1265_v0 = vmul.f32 %v1167_v62, %v1072_v46 }
0x147f   :  { %v1277_v1 = vsel %vm1270_vm4, %v1264_v63, 0.0  ;;  %v1280_v8 = vsel %vm1270_vm4, %v1265_v0, 0.0 }
0x1480   :  { %1278 = vadd.xlane.f32.xlu0 %v1277_v1  ;;  %v1190_v4 = vpop.f32.mrf.mxu2 }
0x1481   :  { %v1266_v6 = vmul.f32 %v1190_v4, %v1073_v42 }
0x1483   :  { %v1283_v9 = vsel %vm1270_vm4, %v1266_v6, 0.0 }
0x1484   :  { %v1213_v11 = vpop.f32.mrf.mxu3  ;;  %v1236_v12 = vpop.f32.mrf.mxu1  ;;  %1281 = vadd.xlane.f32.xlu2 %v1280_v8  ;;  %1284 = vadd.xlane.f32.xlu1 %v1283_v9 }
0x1485   :  { %v1268_v10 = vmul.f32 %v1236_v12, %v1075_v54  ;;  %v1267_v13 = vmul.f32 %v1213_v11, %v1074_v48 }
0x1487   :  { %v1289_v14 = vsel %vm1270_vm4, %v1268_v10, 0.0  ;;  %v1286_v2 = vsel %vm1270_vm4, %v1267_v13, 0.0 }
0x1488   :  { %1290 = vadd.xlane.f32.xlu0 %v1289_v14  ;;  %v1259_v15 = vpop.f32.mrf.mxu2 }
0x1489   :  { %v1269_v17 = vmul.f32 %v1259_v15, %v1076_v53 }
0x148b   :  { %v1292_v3 = vsel %vm1270_vm4, %v1269_v17, 0.0 }
0x148c   :  { %1287 = vadd.xlane.f32.xlu2 %v1286_v2  ;;  %1293 = vadd.xlane.f32.xlu1 %v1292_v3 }
0x14eb   :  { %v1273_v18 = vpop.xlane.xlu1 %1272 }
0x14ec   :  { %v1295_v27 = vsub.f32 0.0, %v1273_v18 }
0x14ee   :  { %v1313_v31 = vperm.slane %v1295_v27, %v1312_v26 }
0x14ef   :  { %v1276_v5 = vpop.xlane.xlu2 %1275 }
0x14f0   :  { %v1296_v22 = vsub.f32 0.0, %v1276_v5 }
0x14f2   :  { %v1314_v29 = vperm.slane %v1296_v22, %v1312_v26 }
0x14f3   :  { %v1279_v20 = vpop.xlane.xlu0 %1278 }
0x14f4   :  { %v1297_v23 = vsub.f32 0.0, %v1279_v20  ;;  %v1322_v34 = vsel %vm1321_vm5, %v1314_v29, %v1313_v31 }
0x14f6   :  { %v1315_v30 = vperm.slane %v1297_v23, %v1312_v26 }
0x14f7   :  { %v1282_v24 = vpop.xlane.xlu2 %1281  ;;  %v1285_v25 = vpop.xlane.xlu1 %1284 }
0x14f8   :  { %v1298_v28 = vsub.f32 0.0, %v1282_v24  ;;  %v1299_v16 = vsub.f32 0.0, %v1285_v25  ;;  %v1324_v35 = vsel %vm1323_vm6, %v1315_v30, %v1322_v34 }
0x14fa   :  { %v1316_v32 = vperm.slane %v1298_v28, %v1312_v26  ;;  %v1317_v36 = vperm.slane %v1299_v16, %v1312_v26 }
0x14fb   :  { %v1291_v33 = vpop.xlane.xlu0 %1290 }
0x14fc   :  { %v1301_v37 = vsub.f32 0.0, %v1291_v33  ;;  %v1326_v39 = vsel %vm1325_vm7, %v1316_v32, %v1324_v35 }
0x14fd   :  { %v1328_v42 = vsel %vm1327_vm8, %v1317_v36, %v1326_v39 }
0x14fe   :  { %v1319_v43 = vperm.slane %v1301_v37, %v1312_v26 }
0x14ff   :  { %v1288_v38 = vpop.xlane.xlu2 %1287  ;;  %v1294_v7 = vpop.xlane.xlu1 %1293 }
0x1500   :  { %v1300_v40 = vsub.f32 0.0, %v1288_v38  ;;  %v1302_v19 = vsub.f32 0.0, %v1294_v7 }
0x1502   :  { %v1318_v41 = vperm.slane %v1300_v40, %v1312_v26  ;;  %v1320_v45 = vperm.slane %v1302_v19, %v1312_v26 }
0x1504   :  { %v1330_v44 = vsel %vm1329_vm9, %v1318_v41, %v1328_v42 }
0x1505   :  { %v1332_v46 = vsel %vm1331_vm10, %v1319_v43, %v1330_v44 }
0x1506   :  { %v1334_v47 = vsel %vm1333_vm11, %v1320_v45, %v1332_v46 }
0x1507   :  { %v1337_v48 = vsel %vm1336_vm12, %v1334_v47, 0.0 }
0x1508   :  { %1338 = vst [vmem:[#allocation11] sm:$0xff] %v1337_v48 }
0x1509   :  { %1349 = dma.vmem_to_hbm [thread:$0]  %s1345_s2, 128, %s1347_s4, [#allocation5]  }
0x150a   :  { %1620 = dma.done.wait [#allocation5], 128  }
0x150b   :  { %1621 = vsyncadd [#allocation5], 4294967168 }
0x150c   :  { %1354 = vsyncpa [#allocation4], 1 }
0x150d   :  { %1355 = vsyncpa [#allocation7], 1 }
0x150e   :  { %1356 = vsyncpa [#allocation10], 1 }
0x150f   :  { %1357 = vsyncpa [#allocation5], 1 }

</bundles_post_ra>
